<compile_context>
chip_gen: v6e
topology: v6e:2x2x1
jax: 0.10.0
libtpu: 0.0.40
codegen_flags: <defaults>
</compile_context>

<pallas_src>
import jax
import jax.numpy as jnp
from jax.experimental import pallas as pl
from jax.experimental.pallas import tpu as pltpu

# ----------------------- configuration -----------------------
VOCAB = 128
EMBED = 32
HIDDEN = 32
LATENT = 16
NUM_CLASSES = 4
MAX_SEQ_LEN = 8
NUM_LAYERS = 1
PAD_ID = 0
BOS_ID = 1
UNK_ID = 3
# denosing_rate = 0.0  -> denoising branch disabled
# dropout_rate  = 0.1  -> identity in eval mode

_VMEM_SPEC = pl.BlockSpec(memory_space=pltpu.MemorySpace.VMEM)


# ----------------------- fused Pallas kernel -----------------------
def _fused_forward_kernel(
        # per-call data
        enc_x_ref, dec_x_ref, len_ref, eps_ref,
        # encoder RNN
        enc_wih_ref, enc_whh_ref, enc_b_ref,
        # decoder RNN
        dec_wih_ref, dec_whh_ref, dec_b_ref,
        # variational linears
        mu_w_ref, mu_b_ref, lv_w_ref, lv_b_ref, vh_w_ref, vh_b_ref,
        # output head
        out_w1_ref, out_b1_ref, out_w2_ref, out_b2_ref,
        # outputs
        logp_ref, mu_ref, logvar_ref,
        # scratch
        hbuf_ref):
    B = len_ref.shape[0]
    S = enc_x_ref.shape[0] // B
    Sd = dec_x_ref.shape[0] // B
    H = enc_whh_ref.shape[0]

    # loop-invariant loads, done once
    lengths = len_ref[...]                       # (B, 1) int32
    enc_whh = enc_whh_ref[...]
    dec_whh = dec_whh_ref[...]

    # Hoisted input projections: one MXU pass per RNN instead of one per step.
    pre_enc = (jnp.dot(enc_x_ref[...], enc_wih_ref[...],
                       preferred_element_type=jnp.float32) + enc_b_ref[...])   # (S*B, H)
    pre_dec = (jnp.dot(dec_x_ref[...], dec_wih_ref[...],
                       preferred_element_type=jnp.float32) + dec_b_ref[...])   # (Sd*B, H)

    # --- encoder recurrence (packed-sequence last-valid-hidden semantics) ---
    h = jnp.zeros((B, H), jnp.float32)
    for t in range(S):                           # static unroll (S = 8)
        h_new = jnp.tanh(pre_enc[t * B:(t + 1) * B, :]
                         + jnp.dot(h, enc_whh, preferred_element_type=jnp.float32))
        # hidden only advances on valid timesteps -> ends at each seq's last step
        h = jnp.where(t < lengths, h_new, h)
    enc_hidden = h                               # (B, H)

    # --- variational (CVAE): mu / logvar / reparameterize / hidden projection ---
    mu = (jnp.dot(enc_hidden, mu_w_ref[...],
                  preferred_element_type=jnp.float32) + mu_b_ref[...])         # (B, L)
    logvar = (jnp.dot(enc_hidden, lv_w_ref[...],
                      preferred_element_type=jnp.float32) + lv_b_ref[...])     # (B, L)
    mu_ref[...] = mu
    logvar_ref[...] = logvar
    noise = mu + eps_ref[...] * jnp.exp(0.5 * logvar)
    noise_hidden = (jnp.dot(noise, vh_w_ref[...],
                            preferred_element_type=jnp.float32) + vh_b_ref[...])
    h = enc_hidden + noise_hidden                # decoder initial hidden (B, H)

    # --- decoder recurrence: only the serial h @ W_hh path stays in the loop ---
    dec_lengths = lengths - 1
    for t in range(Sd):                          # static unroll (Sd = 7)
        h_new = jnp.tanh(pre_dec[t * B:(t + 1) * B, :]
                         + jnp.dot(h, dec_whh, preferred_element_type=jnp.float32))
        valid = t < dec_lengths                  # (B, 1) bool
        h = jnp.where(valid, h_new, h)
        # pad_packed_sequence zero-pads past each sequence's (length-1)
        hbuf_ref[pl.ds(t * B, B), :] = jnp.where(valid, h_new, 0.0)

    # --- output head batched over ALL decoder rows (one pass, not per step) ---
    h_all = hbuf_ref[...]                        # (Sd*B, H), time-major rows
    z = jnp.maximum(jnp.dot(h_all, out_w1_ref[...],
                            preferred_element_type=jnp.float32) + out_b1_ref[...], 0.0)
    logits = (jnp.dot(z, out_w2_ref[...],
                      preferred_element_type=jnp.float32) + out_b2_ref[...])    # (Sd*B, V)
    m = jnp.max(logits, axis=-1, keepdims=True)
    zs = logits - m
    lp = zs - jnp.log(jnp.sum(jnp.exp(zs), axis=-1, keepdims=True))             # log_softmax

    # scatter time-major rows to batch-major output rows (= torch .view(-1, V)):
    # output row = b*Sd + t  <-  lp row = t*B + b.  Static 128-lane row stores.
    for t in range(Sd):
        for b in range(B):
            r = t * B + b
            logp_ref[pl.ds(b * Sd + t, 1), :] = lp[r:r + 1, :]


def _fused_call(enc_x, dec_x, lengths, eps, p):
    B = lengths.shape[0]
    Sd = dec_x.shape[0] // B
    V = p['out_w2_T'].shape[1]
    L = eps.shape[1]
    H = p['enc_whh_T'].shape[0]
    return pl.pallas_call(
        _fused_forward_kernel,
        out_shape=(jax.ShapeDtypeStruct((B * Sd, V), jnp.float32),
                   jax.ShapeDtypeStruct((B, L), jnp.float32),
                   jax.ShapeDtypeStruct((B, L), jnp.float32)),
        in_specs=[_VMEM_SPEC] * 20,
        out_specs=(_VMEM_SPEC, _VMEM_SPEC, _VMEM_SPEC),
        scratch_shapes=[pltpu.VMEM((B * Sd, H), jnp.float32)],
    )(enc_x, dec_x, lengths, eps,
      p['enc_wih_T'], p['enc_whh_T'], p['enc_b'],
      p['dec_wih_T'], p['dec_whh_T'], p['dec_b'],
      p['mu_w_T'], p['mu_b'], p['lv_w_T'], p['lv_b'],
      p['vh_w_T'], p['vh_b'],
      p['out_w1_T'], p['out_b1'], p['out_w2_T'], p['out_b2'])


# ----------------------- parameters -----------------------
def init_params(key):
    ks = jax.random.split(key, 16)

    def u(k, shape, fan_in):
        bound = 1.0 / jnp.sqrt(float(fan_in))
        return jax.random.uniform(k, shape, jnp.float32, -bound, bound)

    seq_emb = jax.random.normal(ks[0], (VOCAB, EMBED), jnp.float32) * 0.1
    seq_emb = seq_emb.at[PAD_ID].set(0.0)          # padding_idx=pad_id
    return dict(
        seq_emb=seq_emb,
        label_emb=jax.random.normal(ks[1], (NUM_CLASSES, EMBED), jnp.float32) * 0.1,
        # encoder RNN (weights pre-transposed: (in, out); bias = b_ih + b_hh)
        enc_wih_T=u(ks[2], (EMBED, HIDDEN), EMBED),
        enc_whh_T=u(ks[3], (HIDDEN, HIDDEN), HIDDEN),
        enc_b=u(ks[4], (1, HIDDEN), HIDDEN),
        # decoder RNN
        dec_wih_T=u(ks[5], (EMBED, HIDDEN), EMBED),
        dec_whh_T=u(ks[6], (HIDDEN, HIDDEN), HIDDEN),
        dec_b=u(ks[7], (1, HIDDEN), HIDDEN),
        # variational linears
        mu_w_T=u(ks[8], (NUM_LAYERS * HIDDEN, LATENT), NUM_LAYERS * HIDDEN),
        mu_b=u(ks[9], (1, LATENT), NUM_LAYERS * HIDDEN),
        lv_w_T=u(ks[10], (NUM_LAYERS * HIDDEN, LATENT), NUM_LAYERS * HIDDEN),
        lv_b=u(ks[11], (1, LATENT), NUM_LAYERS * HIDDEN),
        vh_w_T=u(ks[12], (LATENT, NUM_LAYERS * HIDDEN), LATENT),
        vh_b=u(ks[13], (1, NUM_LAYERS * HIDDEN), LATENT),
        # output head
        out_w1_T=u(ks[14], (HIDDEN, 2 * HIDDEN), HIDDEN),
        out_b1=jnp.zeros((1, 2 * HIDDEN), jnp.float32),
        out_w2_T=u(ks[15], (2 * HIDDEN, VOCAB), 2 * HIDDEN),
        out_b2=jnp.zeros((1, VOCAB), jnp.float32),
    )


# ----------------------- forward pass -----------------------
@jax.jit
def forward(params, input_seq, input_label, eps_key):
    B, S = input_seq.shape
    Sd = S - 1
    # TODO(synk): denosing_rate>0 uses torch RNG for token corruption; disabled (rate=0).

    lengths = jnp.sum(input_seq != PAD_ID, axis=-1).astype(jnp.int32)   # (B,)

    # Embedding gathers done on the transposed int ids so the kernel input is
    # already time-major flat (row = t*B + b).  Dropout = identity in eval mode.
    enc_x = params['seq_emb'][input_seq.T].reshape(S * B, EMBED)        # (S*B, E)
    label_emb = params['label_emb'][input_label]                        # (B, E)
    dec_x = (params['seq_emb'][input_seq[:, :-1].T]
             + label_emb[None, :, :]).reshape(Sd * B, EMBED)            # CVAE label add

    eps = jax.random.normal(eps_key, (B, LATENT), jnp.float32)

    logp, mu, logvar = _fused_call(enc_x, dec_x, lengths.reshape(B, 1), eps, params)

    # torch returns mu/logvar in length-sorted (descending) batch order.
    sorted_idx = jnp.argsort(-lengths)
    return logp, mu[sorted_idx], logvar[sorted_idx]


# ----------------------- main -----------------------
if __name__ == "__main__":
    key = jax.random.PRNGKey(0)
    pkey, ekey = jax.random.split(key)
    params = init_params(pkey)

    # batch=2, seq_len = max_seq_len = 8; second sequence has trailing padding
    input_seq = jnp.array([[BOS_ID, 5, 6, 7, 8, 9, 10, 2],
                           [BOS_ID, 11, 12, 13, 2, PAD_ID, PAD_ID, PAD_ID]],
                          dtype=jnp.int32)
    input_label = jnp.array([0, 3], dtype=jnp.int32)

    logp, mu, logvar = forward(params, input_seq, input_label, ekey)
    jax.block_until_ready((logp, mu, logvar))

    assert logp.shape == (2 * (MAX_SEQ_LEN - 1), VOCAB)
    assert mu.shape == (2, LATENT) and logvar.shape == (2, LATENT)
    # log_softmax rows should exponentiate-sum to ~1
    assert bool(jnp.all(jnp.abs(jnp.exp(logp).sum(-1) - 1.0) < 1e-3))
    print("KERNEL_OK")
</pallas_src>

<mosaic_0001>
module attributes {stable_mosaic.version = 11 : i64} {
  func.func @_fused_forward_kernel(%arg0: memref<16x32xf32, #tpu.memory_space<vmem>>, %arg1: memref<14x32xf32, #tpu.memory_space<vmem>>, %arg2: memref<2x1xi32, #tpu.memory_space<vmem>>, %arg3: memref<2x16xf32, #tpu.memory_space<vmem>>, %arg4: memref<32x32xf32, #tpu.memory_space<vmem>>, %arg5: memref<32x32xf32, #tpu.memory_space<vmem>>, %arg6: memref<1x32xf32, #tpu.memory_space<vmem>>, %arg7: memref<32x32xf32, #tpu.memory_space<vmem>>, %arg8: memref<32x32xf32, #tpu.memory_space<vmem>>, %arg9: memref<1x32xf32, #tpu.memory_space<vmem>>, %arg10: memref<32x16xf32, #tpu.memory_space<vmem>>, %arg11: memref<1x16xf32, #tpu.memory_space<vmem>>, %arg12: memref<32x16xf32, #tpu.memory_space<vmem>>, %arg13: memref<1x16xf32, #tpu.memory_space<vmem>>, %arg14: memref<16x32xf32, #tpu.memory_space<vmem>>, %arg15: memref<1x32xf32, #tpu.memory_space<vmem>>, %arg16: memref<32x64xf32, #tpu.memory_space<vmem>>, %arg17: memref<1x64xf32, #tpu.memory_space<vmem>>, %arg18: memref<64x128xf32, #tpu.memory_space<vmem>>, %arg19: memref<1x128xf32, #tpu.memory_space<vmem>>, %arg20: memref<14x128xf32, #tpu.memory_space<vmem>>, %arg21: memref<2x16xf32, #tpu.memory_space<vmem>>, %arg22: memref<2x16xf32, #tpu.memory_space<vmem>>, %arg23: memref<14x32xf32, #tpu.memory_space<vmem>>) attributes {dimension_semantics = [], scalar_prefetch = 0 : i64, scratch_operands = 1 : i64, tpu.core_type = #tpu.core_type<tc>} {
    %c0 = arith.constant 0 : index
    %c0_0 = arith.constant 0 : index
    %0 = vector.load %arg2[%c0, %c0_0] : memref<2x1xi32, #tpu.memory_space<vmem>>, vector<2x1xi32>
    %c0_1 = arith.constant 0 : index
    %c0_2 = arith.constant 0 : index
    %1 = vector.load %arg5[%c0_1, %c0_2] : memref<32x32xf32, #tpu.memory_space<vmem>>, vector<32x32xf32>
    %c0_3 = arith.constant 0 : index
    %c0_4 = arith.constant 0 : index
    %2 = vector.load %arg8[%c0_3, %c0_4] : memref<32x32xf32, #tpu.memory_space<vmem>>, vector<32x32xf32>
    %c0_5 = arith.constant 0 : index
    %c0_6 = arith.constant 0 : index
    %3 = vector.load %arg0[%c0_5, %c0_6] : memref<16x32xf32, #tpu.memory_space<vmem>>, vector<16x32xf32>
    %c0_7 = arith.constant 0 : index
    %c0_8 = arith.constant 0 : index
    %4 = vector.load %arg4[%c0_7, %c0_8] : memref<32x32xf32, #tpu.memory_space<vmem>>, vector<32x32xf32>
    %cst = arith.constant dense<0.000000e+00> : vector<16x32xf32>
    %5 = tpu.matmul %3, %4, %cst {dimension_numbers = #tpu.dot_dimension_numbers<[1], [0], [0], [1], [0, 0, 1, 1], [], []>} : vector<16x32xf32>, vector<32x32xf32>, vector<16x32xf32> -> vector<16x32xf32>
    %c0_9 = arith.constant 0 : index
    %c0_10 = arith.constant 0 : index
    %6 = vector.load %arg6[%c0_9, %c0_10] : memref<1x32xf32, #tpu.memory_space<vmem>>, vector<1x32xf32>
    %7 = vector.broadcast %6 : vector<1x32xf32> to vector<16x32xf32>
    %8 = arith.addf %5, %7 : vector<16x32xf32>
    %c0_11 = arith.constant 0 : index
    %c0_12 = arith.constant 0 : index
    %9 = vector.load %arg1[%c0_11, %c0_12] : memref<14x32xf32, #tpu.memory_space<vmem>>, vector<14x32xf32>
    %c0_13 = arith.constant 0 : index
    %c0_14 = arith.constant 0 : index
    %10 = vector.load %arg7[%c0_13, %c0_14] : memref<32x32xf32, #tpu.memory_space<vmem>>, vector<32x32xf32>
    %cst_15 = arith.constant dense<0.000000e+00> : vector<14x32xf32>
    %11 = tpu.matmul %9, %10, %cst_15 {dimension_numbers = #tpu.dot_dimension_numbers<[1], [0], [0], [1], [0, 0, 1, 1], [], []>} : vector<14x32xf32>, vector<32x32xf32>, vector<14x32xf32> -> vector<14x32xf32>
    %c0_16 = arith.constant 0 : index
    %c0_17 = arith.constant 0 : index
    %12 = vector.load %arg9[%c0_16, %c0_17] : memref<1x32xf32, #tpu.memory_space<vmem>>, vector<1x32xf32>
    %13 = vector.broadcast %12 : vector<1x32xf32> to vector<14x32xf32>
    %14 = arith.addf %11, %13 : vector<14x32xf32>
    %cst_18 = arith.constant 0.000000e+00 : f32
    %15 = vector.broadcast %cst_18 : f32 to vector<2x32xf32>
    %16 = vector.extract_strided_slice %8 {offsets = [0, 0], sizes = [2, 32], strides = [1, 1]} : vector<16x32xf32> to vector<2x32xf32>
    %cst_19 = arith.constant dense<0.000000e+00> : vector<2x32xf32>
    %17 = tpu.matmul %15, %1, %cst_19 {dimension_numbers = #tpu.dot_dimension_numbers<[1], [0], [0], [1], [0, 0, 1, 1], [], []>} : vector<2x32xf32>, vector<32x32xf32>, vector<2x32xf32> -> vector<2x32xf32>
    %18 = arith.addf %16, %17 : vector<2x32xf32>
    %19 = math.tanh %18 : vector<2x32xf32>
    %c0_i32 = arith.constant 0 : i32
    %20 = vector.broadcast %c0_i32 : i32 to vector<2x1xi32>
    %21 = arith.cmpi sgt, %0, %20 : vector<2x1xi32>
    %22 = vector.shape_cast %21 : vector<2x1xi1> to vector<2x1xi1>
    %23 = vector.broadcast %22 : vector<2x1xi1> to vector<2x32xi1>
    %24 = arith.select %23, %19, %15 : vector<2x32xi1>, vector<2x32xf32>
    %25 = vector.extract_strided_slice %8 {offsets = [2, 0], sizes = [2, 32], strides = [1, 1]} : vector<16x32xf32> to vector<2x32xf32>
    %cst_20 = arith.constant dense<0.000000e+00> : vector<2x32xf32>
    %26 = tpu.matmul %24, %1, %cst_20 {dimension_numbers = #tpu.dot_dimension_numbers<[1], [0], [0], [1], [0, 0, 1, 1], [], []>} : vector<2x32xf32>, vector<32x32xf32>, vector<2x32xf32> -> vector<2x32xf32>
    %27 = arith.addf %25, %26 : vector<2x32xf32>
    %28 = math.tanh %27 : vector<2x32xf32>
    %c1_i32 = arith.constant 1 : i32
    %29 = vector.broadcast %c1_i32 : i32 to vector<2x1xi32>
    %30 = arith.cmpi sgt, %0, %29 : vector<2x1xi32>
    %31 = vector.shape_cast %30 : vector<2x1xi1> to vector<2x1xi1>
    %32 = vector.broadcast %31 : vector<2x1xi1> to vector<2x32xi1>
    %33 = arith.select %32, %28, %24 : vector<2x32xi1>, vector<2x32xf32>
    %34 = vector.extract_strided_slice %8 {offsets = [4, 0], sizes = [2, 32], strides = [1, 1]} : vector<16x32xf32> to vector<2x32xf32>
    %cst_21 = arith.constant dense<0.000000e+00> : vector<2x32xf32>
    %35 = tpu.matmul %33, %1, %cst_21 {dimension_numbers = #tpu.dot_dimension_numbers<[1], [0], [0], [1], [0, 0, 1, 1], [], []>} : vector<2x32xf32>, vector<32x32xf32>, vector<2x32xf32> -> vector<2x32xf32>
    %36 = arith.addf %34, %35 : vector<2x32xf32>
    %37 = math.tanh %36 : vector<2x32xf32>
    %c2_i32 = arith.constant 2 : i32
    %38 = vector.broadcast %c2_i32 : i32 to vector<2x1xi32>
    %39 = arith.cmpi sgt, %0, %38 : vector<2x1xi32>
    %40 = vector.shape_cast %39 : vector<2x1xi1> to vector<2x1xi1>
    %41 = vector.broadcast %40 : vector<2x1xi1> to vector<2x32xi1>
    %42 = arith.select %41, %37, %33 : vector<2x32xi1>, vector<2x32xf32>
    %43 = vector.extract_strided_slice %8 {offsets = [6, 0], sizes = [2, 32], strides = [1, 1]} : vector<16x32xf32> to vector<2x32xf32>
    %cst_22 = arith.constant dense<0.000000e+00> : vector<2x32xf32>
    %44 = tpu.matmul %42, %1, %cst_22 {dimension_numbers = #tpu.dot_dimension_numbers<[1], [0], [0], [1], [0, 0, 1, 1], [], []>} : vector<2x32xf32>, vector<32x32xf32>, vector<2x32xf32> -> vector<2x32xf32>
    %45 = arith.addf %43, %44 : vector<2x32xf32>
    %46 = math.tanh %45 : vector<2x32xf32>
    %c3_i32 = arith.constant 3 : i32
    %47 = vector.broadcast %c3_i32 : i32 to vector<2x1xi32>
    %48 = arith.cmpi sgt, %0, %47 : vector<2x1xi32>
    %49 = vector.shape_cast %48 : vector<2x1xi1> to vector<2x1xi1>
    %50 = vector.broadcast %49 : vector<2x1xi1> to vector<2x32xi1>
    %51 = arith.select %50, %46, %42 : vector<2x32xi1>, vector<2x32xf32>
    %52 = vector.extract_strided_slice %8 {offsets = [8, 0], sizes = [2, 32], strides = [1, 1]} : vector<16x32xf32> to vector<2x32xf32>
    %cst_23 = arith.constant dense<0.000000e+00> : vector<2x32xf32>
    %53 = tpu.matmul %51, %1, %cst_23 {dimension_numbers = #tpu.dot_dimension_numbers<[1], [0], [0], [1], [0, 0, 1, 1], [], []>} : vector<2x32xf32>, vector<32x32xf32>, vector<2x32xf32> -> vector<2x32xf32>
    %54 = arith.addf %52, %53 : vector<2x32xf32>
    %55 = math.tanh %54 : vector<2x32xf32>
    %c4_i32 = arith.constant 4 : i32
    %56 = vector.broadcast %c4_i32 : i32 to vector<2x1xi32>
    %57 = arith.cmpi sgt, %0, %56 : vector<2x1xi32>
    %58 = vector.shape_cast %57 : vector<2x1xi1> to vector<2x1xi1>
    %59 = vector.broadcast %58 : vector<2x1xi1> to vector<2x32xi1>
    %60 = arith.select %59, %55, %51 : vector<2x32xi1>, vector<2x32xf32>
    %61 = vector.extract_strided_slice %8 {offsets = [10, 0], sizes = [2, 32], strides = [1, 1]} : vector<16x32xf32> to vector<2x32xf32>
    %cst_24 = arith.constant dense<0.000000e+00> : vector<2x32xf32>
    %62 = tpu.matmul %60, %1, %cst_24 {dimension_numbers = #tpu.dot_dimension_numbers<[1], [0], [0], [1], [0, 0, 1, 1], [], []>} : vector<2x32xf32>, vector<32x32xf32>, vector<2x32xf32> -> vector<2x32xf32>
    %63 = arith.addf %61, %62 : vector<2x32xf32>
    %64 = math.tanh %63 : vector<2x32xf32>
    %c5_i32 = arith.constant 5 : i32
    %65 = vector.broadcast %c5_i32 : i32 to vector<2x1xi32>
    %66 = arith.cmpi sgt, %0, %65 : vector<2x1xi32>
    %67 = vector.shape_cast %66 : vector<2x1xi1> to vector<2x1xi1>
    %68 = vector.broadcast %67 : vector<2x1xi1> to vector<2x32xi1>
    %69 = arith.select %68, %64, %60 : vector<2x32xi1>, vector<2x32xf32>
    %70 = vector.extract_strided_slice %8 {offsets = [12, 0], sizes = [2, 32], strides = [1, 1]} : vector<16x32xf32> to vector<2x32xf32>
    %cst_25 = arith.constant dense<0.000000e+00> : vector<2x32xf32>
    %71 = tpu.matmul %69, %1, %cst_25 {dimension_numbers = #tpu.dot_dimension_numbers<[1], [0], [0], [1], [0, 0, 1, 1], [], []>} : vector<2x32xf32>, vector<32x32xf32>, vector<2x32xf32> -> vector<2x32xf32>
    %72 = arith.addf %70, %71 : vector<2x32xf32>
    %73 = math.tanh %72 : vector<2x32xf32>
    %c6_i32 = arith.constant 6 : i32
    %74 = vector.broadcast %c6_i32 : i32 to vector<2x1xi32>
    %75 = arith.cmpi sgt, %0, %74 : vector<2x1xi32>
    %76 = vector.shape_cast %75 : vector<2x1xi1> to vector<2x1xi1>
    %77 = vector.broadcast %76 : vector<2x1xi1> to vector<2x32xi1>
    %78 = arith.select %77, %73, %69 : vector<2x32xi1>, vector<2x32xf32>
    %79 = vector.extract_strided_slice %8 {offsets = [14, 0], sizes = [2, 32], strides = [1, 1]} : vector<16x32xf32> to vector<2x32xf32>
    %cst_26 = arith.constant dense<0.000000e+00> : vector<2x32xf32>
    %80 = tpu.matmul %78, %1, %cst_26 {dimension_numbers = #tpu.dot_dimension_numbers<[1], [0], [0], [1], [0, 0, 1, 1], [], []>} : vector<2x32xf32>, vector<32x32xf32>, vector<2x32xf32> -> vector<2x32xf32>
    %81 = arith.addf %79, %80 : vector<2x32xf32>
    %82 = math.tanh %81 : vector<2x32xf32>
    %c7_i32 = arith.constant 7 : i32
    %83 = vector.broadcast %c7_i32 : i32 to vector<2x1xi32>
    %84 = arith.cmpi sgt, %0, %83 : vector<2x1xi32>
    %85 = vector.shape_cast %84 : vector<2x1xi1> to vector<2x1xi1>
    %86 = vector.broadcast %85 : vector<2x1xi1> to vector<2x32xi1>
    %87 = arith.select %86, %82, %78 : vector<2x32xi1>, vector<2x32xf32>
    %c0_27 = arith.constant 0 : index
    %c0_28 = arith.constant 0 : index
    %88 = vector.load %arg10[%c0_27, %c0_28] : memref<32x16xf32, #tpu.memory_space<vmem>>, vector<32x16xf32>
    %cst_29 = arith.constant dense<0.000000e+00> : vector<2x16xf32>
    %89 = tpu.matmul %87, %88, %cst_29 {dimension_numbers = #tpu.dot_dimension_numbers<[1], [0], [0], [1], [0, 0, 1, 1], [], []>} : vector<2x32xf32>, vector<32x16xf32>, vector<2x16xf32> -> vector<2x16xf32>
    %c0_30 = arith.constant 0 : index
    %c0_31 = arith.constant 0 : index
    %90 = vector.load %arg11[%c0_30, %c0_31] : memref<1x16xf32, #tpu.memory_space<vmem>>, vector<1x16xf32>
    %91 = vector.broadcast %90 : vector<1x16xf32> to vector<2x16xf32>
    %92 = arith.addf %89, %91 : vector<2x16xf32>
    %c0_32 = arith.constant 0 : index
    %c0_33 = arith.constant 0 : index
    %93 = vector.load %arg12[%c0_32, %c0_33] : memref<32x16xf32, #tpu.memory_space<vmem>>, vector<32x16xf32>
    %cst_34 = arith.constant dense<0.000000e+00> : vector<2x16xf32>
    %94 = tpu.matmul %87, %93, %cst_34 {dimension_numbers = #tpu.dot_dimension_numbers<[1], [0], [0], [1], [0, 0, 1, 1], [], []>} : vector<2x32xf32>, vector<32x16xf32>, vector<2x16xf32> -> vector<2x16xf32>
    %c0_35 = arith.constant 0 : index
    %c0_36 = arith.constant 0 : index
    %95 = vector.load %arg13[%c0_35, %c0_36] : memref<1x16xf32, #tpu.memory_space<vmem>>, vector<1x16xf32>
    %96 = vector.broadcast %95 : vector<1x16xf32> to vector<2x16xf32>
    %97 = arith.addf %94, %96 : vector<2x16xf32>
    %c0_37 = arith.constant 0 : index
    %c0_38 = arith.constant 0 : index
    %98 = vector.load %arg21[%c0_37, %c0_38] : memref<2x16xf32, #tpu.memory_space<vmem>>, vector<2x16xf32>
    tpu.vector_store %arg21[%c0_37, %c0_38], %92 {strides = array<i32>} : memref<2x16xf32, #tpu.memory_space<vmem>>, vector<2x16xf32>,
    %c0_39 = arith.constant 0 : index
    %c0_40 = arith.constant 0 : index
    %99 = vector.load %arg22[%c0_39, %c0_40] : memref<2x16xf32, #tpu.memory_space<vmem>>, vector<2x16xf32>
    tpu.vector_store %arg22[%c0_39, %c0_40], %97 {strides = array<i32>} : memref<2x16xf32, #tpu.memory_space<vmem>>, vector<2x16xf32>,
    %c0_41 = arith.constant 0 : index
    %c0_42 = arith.constant 0 : index
    %100 = vector.load %arg3[%c0_41, %c0_42] : memref<2x16xf32, #tpu.memory_space<vmem>>, vector<2x16xf32>
    %cst_43 = arith.constant 5.000000e-01 : f32
    %101 = vector.broadcast %cst_43 : f32 to vector<2x16xf32>
    %102 = arith.mulf %101, %97 : vector<2x16xf32>
    %103 = math.exp %102 : vector<2x16xf32>
    %104 = arith.mulf %100, %103 : vector<2x16xf32>
    %105 = arith.addf %92, %104 : vector<2x16xf32>
    %c0_44 = arith.constant 0 : index
    %c0_45 = arith.constant 0 : index
    %106 = vector.load %arg14[%c0_44, %c0_45] : memref<16x32xf32, #tpu.memory_space<vmem>>, vector<16x32xf32>
    %cst_46 = arith.constant dense<0.000000e+00> : vector<2x32xf32>
    %107 = tpu.matmul %105, %106, %cst_46 {dimension_numbers = #tpu.dot_dimension_numbers<[1], [0], [0], [1], [0, 0, 1, 1], [], []>} : vector<2x16xf32>, vector<16x32xf32>, vector<2x32xf32> -> vector<2x32xf32>
    %c0_47 = arith.constant 0 : index
    %c0_48 = arith.constant 0 : index
    %108 = vector.load %arg15[%c0_47, %c0_48] : memref<1x32xf32, #tpu.memory_space<vmem>>, vector<1x32xf32>
    %109 = vector.broadcast %108 : vector<1x32xf32> to vector<2x32xf32>
    %110 = arith.addf %107, %109 : vector<2x32xf32>
    %111 = arith.addf %87, %110 : vector<2x32xf32>
    %c1_i32_49 = arith.constant 1 : i32
    %112 = vector.broadcast %c1_i32_49 : i32 to vector<2x1xi32>
    %113 = arith.subi %0, %112 : vector<2x1xi32>
    %114 = vector.extract_strided_slice %14 {offsets = [0, 0], sizes = [2, 32], strides = [1, 1]} : vector<14x32xf32> to vector<2x32xf32>
    %cst_50 = arith.constant dense<0.000000e+00> : vector<2x32xf32>
    %115 = tpu.matmul %111, %2, %cst_50 {dimension_numbers = #tpu.dot_dimension_numbers<[1], [0], [0], [1], [0, 0, 1, 1], [], []>} : vector<2x32xf32>, vector<32x32xf32>, vector<2x32xf32> -> vector<2x32xf32>
    %116 = arith.addf %114, %115 : vector<2x32xf32>
    %117 = math.tanh %116 : vector<2x32xf32>
    %c0_i32_51 = arith.constant 0 : i32
    %118 = vector.broadcast %c0_i32_51 : i32 to vector<2x1xi32>
    %119 = arith.cmpi sgt, %113, %118 : vector<2x1xi32>
    %120 = vector.shape_cast %119 : vector<2x1xi1> to vector<2x1xi1>
    %121 = vector.broadcast %120 : vector<2x1xi1> to vector<2x32xi1>
    %122 = arith.select %121, %117, %111 : vector<2x32xi1>, vector<2x32xf32>
    %cst_52 = arith.constant 0.000000e+00 : f32
    %123 = vector.shape_cast %119 : vector<2x1xi1> to vector<2x1xi1>
    %124 = vector.broadcast %123 : vector<2x1xi1> to vector<2x32xi1>
    %125 = vector.broadcast %cst_52 : f32 to vector<2x32xf32>
    %126 = arith.select %124, %117, %125 : vector<2x32xi1>, vector<2x32xf32>
    %c0_53 = arith.constant 0 : index
    %c0_54 = arith.constant 0 : index
    %127 = vector.load %arg23[%c0_53, %c0_54] : memref<14x32xf32, #tpu.memory_space<vmem>>, vector<2x32xf32>
    tpu.vector_store %arg23[%c0_53, %c0_54], %126 {strides = array<i32>} : memref<14x32xf32, #tpu.memory_space<vmem>>, vector<2x32xf32>,
    %128 = vector.extract_strided_slice %14 {offsets = [2, 0], sizes = [2, 32], strides = [1, 1]} : vector<14x32xf32> to vector<2x32xf32>
    %cst_55 = arith.constant dense<0.000000e+00> : vector<2x32xf32>
    %129 = tpu.matmul %122, %2, %cst_55 {dimension_numbers = #tpu.dot_dimension_numbers<[1], [0], [0], [1], [0, 0, 1, 1], [], []>} : vector<2x32xf32>, vector<32x32xf32>, vector<2x32xf32> -> vector<2x32xf32>
    %130 = arith.addf %128, %129 : vector<2x32xf32>
    %131 = math.tanh %130 : vector<2x32xf32>
    %c1_i32_56 = arith.constant 1 : i32
    %132 = vector.broadcast %c1_i32_56 : i32 to vector<2x1xi32>
    %133 = arith.cmpi sgt, %113, %132 : vector<2x1xi32>
    %134 = vector.shape_cast %133 : vector<2x1xi1> to vector<2x1xi1>
    %135 = vector.broadcast %134 : vector<2x1xi1> to vector<2x32xi1>
    %136 = arith.select %135, %131, %122 : vector<2x32xi1>, vector<2x32xf32>
    %cst_57 = arith.constant 0.000000e+00 : f32
    %137 = vector.shape_cast %133 : vector<2x1xi1> to vector<2x1xi1>
    %138 = vector.broadcast %137 : vector<2x1xi1> to vector<2x32xi1>
    %139 = vector.broadcast %cst_57 : f32 to vector<2x32xf32>
    %140 = arith.select %138, %131, %139 : vector<2x32xi1>, vector<2x32xf32>
    %c2 = arith.constant 2 : index
    %c0_58 = arith.constant 0 : index
    %141 = vector.load %arg23[%c2, %c0_58] : memref<14x32xf32, #tpu.memory_space<vmem>>, vector<2x32xf32>
    tpu.vector_store %arg23[%c2, %c0_58], %140 {strides = array<i32>} : memref<14x32xf32, #tpu.memory_space<vmem>>, vector<2x32xf32>,
    %142 = vector.extract_strided_slice %14 {offsets = [4, 0], sizes = [2, 32], strides = [1, 1]} : vector<14x32xf32> to vector<2x32xf32>
    %cst_59 = arith.constant dense<0.000000e+00> : vector<2x32xf32>
    %143 = tpu.matmul %136, %2, %cst_59 {dimension_numbers = #tpu.dot_dimension_numbers<[1], [0], [0], [1], [0, 0, 1, 1], [], []>} : vector<2x32xf32>, vector<32x32xf32>, vector<2x32xf32> -> vector<2x32xf32>
    %144 = arith.addf %142, %143 : vector<2x32xf32>
    %145 = math.tanh %144 : vector<2x32xf32>
    %c2_i32_60 = arith.constant 2 : i32
    %146 = vector.broadcast %c2_i32_60 : i32 to vector<2x1xi32>
    %147 = arith.cmpi sgt, %113, %146 : vector<2x1xi32>
    %148 = vector.shape_cast %147 : vector<2x1xi1> to vector<2x1xi1>
    %149 = vector.broadcast %148 : vector<2x1xi1> to vector<2x32xi1>
    %150 = arith.select %149, %145, %136 : vector<2x32xi1>, vector<2x32xf32>
    %cst_61 = arith.constant 0.000000e+00 : f32
    %151 = vector.shape_cast %147 : vector<2x1xi1> to vector<2x1xi1>
    %152 = vector.broadcast %151 : vector<2x1xi1> to vector<2x32xi1>
    %153 = vector.broadcast %cst_61 : f32 to vector<2x32xf32>
    %154 = arith.select %152, %145, %153 : vector<2x32xi1>, vector<2x32xf32>
    %c4 = arith.constant 4 : index
    %c0_62 = arith.constant 0 : index
    %155 = vector.load %arg23[%c4, %c0_62] : memref<14x32xf32, #tpu.memory_space<vmem>>, vector<2x32xf32>
    tpu.vector_store %arg23[%c4, %c0_62], %154 {strides = array<i32>} : memref<14x32xf32, #tpu.memory_space<vmem>>, vector<2x32xf32>,
    %156 = vector.extract_strided_slice %14 {offsets = [6, 0], sizes = [2, 32], strides = [1, 1]} : vector<14x32xf32> to vector<2x32xf32>
    %cst_63 = arith.constant dense<0.000000e+00> : vector<2x32xf32>
    %157 = tpu.matmul %150, %2, %cst_63 {dimension_numbers = #tpu.dot_dimension_numbers<[1], [0], [0], [1], [0, 0, 1, 1], [], []>} : vector<2x32xf32>, vector<32x32xf32>, vector<2x32xf32> -> vector<2x32xf32>
    %158 = arith.addf %156, %157 : vector<2x32xf32>
    %159 = math.tanh %158 : vector<2x32xf32>
    %c3_i32_64 = arith.constant 3 : i32
    %160 = vector.broadcast %c3_i32_64 : i32 to vector<2x1xi32>
    %161 = arith.cmpi sgt, %113, %160 : vector<2x1xi32>
    %162 = vector.shape_cast %161 : vector<2x1xi1> to vector<2x1xi1>
    %163 = vector.broadcast %162 : vector<2x1xi1> to vector<2x32xi1>
    %164 = arith.select %163, %159, %150 : vector<2x32xi1>, vector<2x32xf32>
    %cst_65 = arith.constant 0.000000e+00 : f32
    %165 = vector.shape_cast %161 : vector<2x1xi1> to vector<2x1xi1>
    %166 = vector.broadcast %165 : vector<2x1xi1> to vector<2x32xi1>
    %167 = vector.broadcast %cst_65 : f32 to vector<2x32xf32>
    %168 = arith.select %166, %159, %167 : vector<2x32xi1>, vector<2x32xf32>
    %c6 = arith.constant 6 : index
    %c0_66 = arith.constant 0 : index
    %169 = vector.load %arg23[%c6, %c0_66] : memref<14x32xf32, #tpu.memory_space<vmem>>, vector<2x32xf32>
    tpu.vector_store %arg23[%c6, %c0_66], %168 {strides = array<i32>} : memref<14x32xf32, #tpu.memory_space<vmem>>, vector<2x32xf32>,
    %170 = vector.extract_strided_slice %14 {offsets = [8, 0], sizes = [2, 32], strides = [1, 1]} : vector<14x32xf32> to vector<2x32xf32>
    %cst_67 = arith.constant dense<0.000000e+00> : vector<2x32xf32>
    %171 = tpu.matmul %164, %2, %cst_67 {dimension_numbers = #tpu.dot_dimension_numbers<[1], [0], [0], [1], [0, 0, 1, 1], [], []>} : vector<2x32xf32>, vector<32x32xf32>, vector<2x32xf32> -> vector<2x32xf32>
    %172 = arith.addf %170, %171 : vector<2x32xf32>
    %173 = math.tanh %172 : vector<2x32xf32>
    %c4_i32_68 = arith.constant 4 : i32
    %174 = vector.broadcast %c4_i32_68 : i32 to vector<2x1xi32>
    %175 = arith.cmpi sgt, %113, %174 : vector<2x1xi32>
    %176 = vector.shape_cast %175 : vector<2x1xi1> to vector<2x1xi1>
    %177 = vector.broadcast %176 : vector<2x1xi1> to vector<2x32xi1>
    %178 = arith.select %177, %173, %164 : vector<2x32xi1>, vector<2x32xf32>
    %cst_69 = arith.constant 0.000000e+00 : f32
    %179 = vector.shape_cast %175 : vector<2x1xi1> to vector<2x1xi1>
    %180 = vector.broadcast %179 : vector<2x1xi1> to vector<2x32xi1>
    %181 = vector.broadcast %cst_69 : f32 to vector<2x32xf32>
    %182 = arith.select %180, %173, %181 : vector<2x32xi1>, vector<2x32xf32>
    %c8 = arith.constant 8 : index
    %c0_70 = arith.constant 0 : index
    %183 = vector.load %arg23[%c8, %c0_70] : memref<14x32xf32, #tpu.memory_space<vmem>>, vector<2x32xf32>
    tpu.vector_store %arg23[%c8, %c0_70], %182 {strides = array<i32>} : memref<14x32xf32, #tpu.memory_space<vmem>>, vector<2x32xf32>,
    %184 = vector.extract_strided_slice %14 {offsets = [10, 0], sizes = [2, 32], strides = [1, 1]} : vector<14x32xf32> to vector<2x32xf32>
    %cst_71 = arith.constant dense<0.000000e+00> : vector<2x32xf32>
    %185 = tpu.matmul %178, %2, %cst_71 {dimension_numbers = #tpu.dot_dimension_numbers<[1], [0], [0], [1], [0, 0, 1, 1], [], []>} : vector<2x32xf32>, vector<32x32xf32>, vector<2x32xf32> -> vector<2x32xf32>
    %186 = arith.addf %184, %185 : vector<2x32xf32>
    %187 = math.tanh %186 : vector<2x32xf32>
    %c5_i32_72 = arith.constant 5 : i32
    %188 = vector.broadcast %c5_i32_72 : i32 to vector<2x1xi32>
    %189 = arith.cmpi sgt, %113, %188 : vector<2x1xi32>
    %190 = vector.shape_cast %189 : vector<2x1xi1> to vector<2x1xi1>
    %191 = vector.broadcast %190 : vector<2x1xi1> to vector<2x32xi1>
    %192 = arith.select %191, %187, %178 : vector<2x32xi1>, vector<2x32xf32>
    %cst_73 = arith.constant 0.000000e+00 : f32
    %193 = vector.shape_cast %189 : vector<2x1xi1> to vector<2x1xi1>
    %194 = vector.broadcast %193 : vector<2x1xi1> to vector<2x32xi1>
    %195 = vector.broadcast %cst_73 : f32 to vector<2x32xf32>
    %196 = arith.select %194, %187, %195 : vector<2x32xi1>, vector<2x32xf32>
    %c10 = arith.constant 10 : index
    %c0_74 = arith.constant 0 : index
    %197 = vector.load %arg23[%c10, %c0_74] : memref<14x32xf32, #tpu.memory_space<vmem>>, vector<2x32xf32>
    tpu.vector_store %arg23[%c10, %c0_74], %196 {strides = array<i32>} : memref<14x32xf32, #tpu.memory_space<vmem>>, vector<2x32xf32>,
    %198 = vector.extract_strided_slice %14 {offsets = [12, 0], sizes = [2, 32], strides = [1, 1]} : vector<14x32xf32> to vector<2x32xf32>
    %cst_75 = arith.constant dense<0.000000e+00> : vector<2x32xf32>
    %199 = tpu.matmul %192, %2, %cst_75 {dimension_numbers = #tpu.dot_dimension_numbers<[1], [0], [0], [1], [0, 0, 1, 1], [], []>} : vector<2x32xf32>, vector<32x32xf32>, vector<2x32xf32> -> vector<2x32xf32>
    %200 = arith.addf %198, %199 : vector<2x32xf32>
    %201 = math.tanh %200 : vector<2x32xf32>
    %c6_i32_76 = arith.constant 6 : i32
    %202 = vector.broadcast %c6_i32_76 : i32 to vector<2x1xi32>
    %203 = arith.cmpi sgt, %113, %202 : vector<2x1xi32>
    %cst_77 = arith.constant 0.000000e+00 : f32
    %204 = vector.shape_cast %203 : vector<2x1xi1> to vector<2x1xi1>
    %205 = vector.broadcast %204 : vector<2x1xi1> to vector<2x32xi1>
    %206 = vector.broadcast %cst_77 : f32 to vector<2x32xf32>
    %207 = arith.select %205, %201, %206 : vector<2x32xi1>, vector<2x32xf32>
    %c12 = arith.constant 12 : index
    %c0_78 = arith.constant 0 : index
    %208 = vector.load %arg23[%c12, %c0_78] : memref<14x32xf32, #tpu.memory_space<vmem>>, vector<2x32xf32>
    tpu.vector_store %arg23[%c12, %c0_78], %207 {strides = array<i32>} : memref<14x32xf32, #tpu.memory_space<vmem>>, vector<2x32xf32>,
    %c0_79 = arith.constant 0 : index
    %c0_80 = arith.constant 0 : index
    %209 = vector.load %arg23[%c0_79, %c0_80] : memref<14x32xf32, #tpu.memory_space<vmem>>, vector<14x32xf32>
    %c0_81 = arith.constant 0 : index
    %c0_82 = arith.constant 0 : index
    %210 = vector.load %arg16[%c0_81, %c0_82] : memref<32x64xf32, #tpu.memory_space<vmem>>, vector<32x64xf32>
    %cst_83 = arith.constant dense<0.000000e+00> : vector<14x64xf32>
    %211 = tpu.matmul %209, %210, %cst_83 {dimension_numbers = #tpu.dot_dimension_numbers<[1], [0], [0], [1], [0, 0, 1, 1], [], []>} : vector<14x32xf32>, vector<32x64xf32>, vector<14x64xf32> -> vector<14x64xf32>
    %c0_84 = arith.constant 0 : index
    %c0_85 = arith.constant 0 : index
    %212 = vector.load %arg17[%c0_84, %c0_85] : memref<1x64xf32, #tpu.memory_space<vmem>>, vector<1x64xf32>
    %213 = vector.broadcast %212 : vector<1x64xf32> to vector<14x64xf32>
    %214 = arith.addf %211, %213 : vector<14x64xf32>
    %cst_86 = arith.constant 0.000000e+00 : f32
    %215 = vector.broadcast %cst_86 : f32 to vector<14x64xf32>
    %216 = arith.maximumf %214, %215 : vector<14x64xf32>
    %c0_87 = arith.constant 0 : index
    %c0_88 = arith.constant 0 : index
    %217 = vector.load %arg18[%c0_87, %c0_88] : memref<64x128xf32, #tpu.memory_space<vmem>>, vector<64x128xf32>
    %cst_89 = arith.constant dense<0.000000e+00> : vector<14x128xf32>
    %218 = tpu.matmul %216, %217, %cst_89 {dimension_numbers = #tpu.dot_dimension_numbers<[1], [0], [0], [1], [0, 0, 1, 1], [], []>} : vector<14x64xf32>, vector<64x128xf32>, vector<14x128xf32> -> vector<14x128xf32>
    %c0_90 = arith.constant 0 : index
    %c0_91 = arith.constant 0 : index
    %219 = vector.load %arg19[%c0_90, %c0_91] : memref<1x128xf32, #tpu.memory_space<vmem>>, vector<1x128xf32>
    %220 = vector.broadcast %219 : vector<1x128xf32> to vector<14x128xf32>
    %221 = arith.addf %218, %220 : vector<14x128xf32>
    %cst_92 = arith.constant dense<0xFF800000> : vector<14xf32>
    %222 = vector.multi_reduction <maximumf>, %221, %cst_92 [1] : vector<14x128xf32> to vector<14xf32>
    %223 = vector.shape_cast %222 : vector<14xf32> to vector<14x1xf32>
    %224 = vector.broadcast %223 : vector<14x1xf32> to vector<14x128xf32>
    %225 = arith.subf %221, %224 : vector<14x128xf32>
    %226 = math.exp %225 : vector<14x128xf32>
    %cst_93 = arith.constant dense<0.000000e+00> : vector<14xf32>
    %227 = vector.multi_reduction <add>, %226, %cst_93 [1] : vector<14x128xf32> to vector<14xf32>
    %228 = vector.shape_cast %227 : vector<14xf32> to vector<14x1xf32>
    %229 = math.log %228 : vector<14x1xf32>
    %230 = vector.broadcast %229 : vector<14x1xf32> to vector<14x128xf32>
    %231 = arith.subf %225, %230 : vector<14x128xf32>
    %232 = vector.extract_strided_slice %231 {offsets = [0, 0], sizes = [1, 128], strides = [1, 1]} : vector<14x128xf32> to vector<1x128xf32>
    %c0_94 = arith.constant 0 : index
    %c0_95 = arith.constant 0 : index
    %233 = vector.load %arg20[%c0_94, %c0_95] : memref<14x128xf32, #tpu.memory_space<vmem>>, vector<1x128xf32>
    tpu.vector_store %arg20[%c0_94, %c0_95], %232 {strides = array<i32>} : memref<14x128xf32, #tpu.memory_space<vmem>>, vector<1x128xf32>,
    %234 = vector.extract_strided_slice %231 {offsets = [1, 0], sizes = [1, 128], strides = [1, 1]} : vector<14x128xf32> to vector<1x128xf32>
    %c7 = arith.constant 7 : index
    %c0_96 = arith.constant 0 : index
    %235 = vector.load %arg20[%c7, %c0_96] : memref<14x128xf32, #tpu.memory_space<vmem>>, vector<1x128xf32>
    tpu.vector_store %arg20[%c7, %c0_96], %234 {strides = array<i32>} : memref<14x128xf32, #tpu.memory_space<vmem>>, vector<1x128xf32>,
    %236 = vector.extract_strided_slice %231 {offsets = [2, 0], sizes = [1, 128], strides = [1, 1]} : vector<14x128xf32> to vector<1x128xf32>
    %c1 = arith.constant 1 : index
    %c0_97 = arith.constant 0 : index
    %237 = vector.load %arg20[%c1, %c0_97] : memref<14x128xf32, #tpu.memory_space<vmem>>, vector<1x128xf32>
    tpu.vector_store %arg20[%c1, %c0_97], %236 {strides = array<i32>} : memref<14x128xf32, #tpu.memory_space<vmem>>, vector<1x128xf32>,
    %238 = vector.extract_strided_slice %231 {offsets = [3, 0], sizes = [1, 128], strides = [1, 1]} : vector<14x128xf32> to vector<1x128xf32>
    %c8_98 = arith.constant 8 : index
    %c0_99 = arith.constant 0 : index
    %239 = vector.load %arg20[%c8_98, %c0_99] : memref<14x128xf32, #tpu.memory_space<vmem>>, vector<1x128xf32>
    tpu.vector_store %arg20[%c8_98, %c0_99], %238 {strides = array<i32>} : memref<14x128xf32, #tpu.memory_space<vmem>>, vector<1x128xf32>,
    %240 = vector.extract_strided_slice %231 {offsets = [4, 0], sizes = [1, 128], strides = [1, 1]} : vector<14x128xf32> to vector<1x128xf32>
    %c2_100 = arith.constant 2 : index
    %c0_101 = arith.constant 0 : index
    %241 = vector.load %arg20[%c2_100, %c0_101] : memref<14x128xf32, #tpu.memory_space<vmem>>, vector<1x128xf32>
    tpu.vector_store %arg20[%c2_100, %c0_101], %240 {strides = array<i32>} : memref<14x128xf32, #tpu.memory_space<vmem>>, vector<1x128xf32>,
    %242 = vector.extract_strided_slice %231 {offsets = [5, 0], sizes = [1, 128], strides = [1, 1]} : vector<14x128xf32> to vector<1x128xf32>
    %c9 = arith.constant 9 : index
    %c0_102 = arith.constant 0 : index
    %243 = vector.load %arg20[%c9, %c0_102] : memref<14x128xf32, #tpu.memory_space<vmem>>, vector<1x128xf32>
    tpu.vector_store %arg20[%c9, %c0_102], %242 {strides = array<i32>} : memref<14x128xf32, #tpu.memory_space<vmem>>, vector<1x128xf32>,
    %244 = vector.extract_strided_slice %231 {offsets = [6, 0], sizes = [1, 128], strides = [1, 1]} : vector<14x128xf32> to vector<1x128xf32>
    %c3 = arith.constant 3 : index
    %c0_103 = arith.constant 0 : index
    %245 = vector.load %arg20[%c3, %c0_103] : memref<14x128xf32, #tpu.memory_space<vmem>>, vector<1x128xf32>
    tpu.vector_store %arg20[%c3, %c0_103], %244 {strides = array<i32>} : memref<14x128xf32, #tpu.memory_space<vmem>>, vector<1x128xf32>,
    %246 = vector.extract_strided_slice %231 {offsets = [7, 0], sizes = [1, 128], strides = [1, 1]} : vector<14x128xf32> to vector<1x128xf32>
    %c10_104 = arith.constant 10 : index
    %c0_105 = arith.constant 0 : index
    %247 = vector.load %arg20[%c10_104, %c0_105] : memref<14x128xf32, #tpu.memory_space<vmem>>, vector<1x128xf32>
    tpu.vector_store %arg20[%c10_104, %c0_105], %246 {strides = array<i32>} : memref<14x128xf32, #tpu.memory_space<vmem>>, vector<1x128xf32>,
    %248 = vector.extract_strided_slice %231 {offsets = [8, 0], sizes = [1, 128], strides = [1, 1]} : vector<14x128xf32> to vector<1x128xf32>
    %c4_106 = arith.constant 4 : index
    %c0_107 = arith.constant 0 : index
    %249 = vector.load %arg20[%c4_106, %c0_107] : memref<14x128xf32, #tpu.memory_space<vmem>>, vector<1x128xf32>
    tpu.vector_store %arg20[%c4_106, %c0_107], %248 {strides = array<i32>} : memref<14x128xf32, #tpu.memory_space<vmem>>, vector<1x128xf32>,
    %250 = vector.extract_strided_slice %231 {offsets = [9, 0], sizes = [1, 128], strides = [1, 1]} : vector<14x128xf32> to vector<1x128xf32>
    %c11 = arith.constant 11 : index
    %c0_108 = arith.constant 0 : index
    %251 = vector.load %arg20[%c11, %c0_108] : memref<14x128xf32, #tpu.memory_space<vmem>>, vector<1x128xf32>
    tpu.vector_store %arg20[%c11, %c0_108], %250 {strides = array<i32>} : memref<14x128xf32, #tpu.memory_space<vmem>>, vector<1x128xf32>,
    %252 = vector.extract_strided_slice %231 {offsets = [10, 0], sizes = [1, 128], strides = [1, 1]} : vector<14x128xf32> to vector<1x128xf32>
    %c5 = arith.constant 5 : index
    %c0_109 = arith.constant 0 : index
    %253 = vector.load %arg20[%c5, %c0_109] : memref<14x128xf32, #tpu.memory_space<vmem>>, vector<1x128xf32>
    tpu.vector_store %arg20[%c5, %c0_109], %252 {strides = array<i32>} : memref<14x128xf32, #tpu.memory_space<vmem>>, vector<1x128xf32>,
    %254 = vector.extract_strided_slice %231 {offsets = [11, 0], sizes = [1, 128], strides = [1, 1]} : vector<14x128xf32> to vector<1x128xf32>
    %c12_110 = arith.constant 12 : index
    %c0_111 = arith.constant 0 : index
    %255 = vector.load %arg20[%c12_110, %c0_111] : memref<14x128xf32, #tpu.memory_space<vmem>>, vector<1x128xf32>
    tpu.vector_store %arg20[%c12_110, %c0_111], %254 {strides = array<i32>} : memref<14x128xf32, #tpu.memory_space<vmem>>, vector<1x128xf32>,
    %256 = vector.extract_strided_slice %231 {offsets = [12, 0], sizes = [1, 128], strides = [1, 1]} : vector<14x128xf32> to vector<1x128xf32>
    %c6_112 = arith.constant 6 : index
    %c0_113 = arith.constant 0 : index
    %257 = vector.load %arg20[%c6_112, %c0_113] : memref<14x128xf32, #tpu.memory_space<vmem>>, vector<1x128xf32>
    tpu.vector_store %arg20[%c6_112, %c0_113], %256 {strides = array<i32>} : memref<14x128xf32, #tpu.memory_space<vmem>>, vector<1x128xf32>,
    %258 = vector.extract_strided_slice %231 {offsets = [13, 0], sizes = [1, 128], strides = [1, 1]} : vector<14x128xf32> to vector<1x128xf32>
    %c13 = arith.constant 13 : index
    %c0_114 = arith.constant 0 : index
    %259 = vector.load %arg20[%c13, %c0_114] : memref<14x128xf32, #tpu.memory_space<vmem>>, vector<1x128xf32>
    tpu.vector_store %arg20[%c13, %c0_114], %258 {strides = array<i32>} : memref<14x128xf32, #tpu.memory_space<vmem>>, vector<1x128xf32>,
    return
  }
}

</mosaic_0001>

<bundles_post_ra>
// kernel: neg.1
= control target key start
LH: loop header
LB: loop body
LE: loop exit
PB: predicated region body
PF: predicated region fallthrough
CT: control target
= control target key end

     0   :  { %s24_s0 = inlined_call_operand.vmem [shape: s32[2], index: 0, kind: input, shape index: {}]   ;;  %s25_s1 = inlined_call_operand.vmem [shape: s32[2], index: 1, kind: output, shape index: {}]  }
   0x1   :  { %v2_v0 = vld [vmem:[%s24_s0] sm:$0x1] }
   0x2   :  { %v5_v1 = vsub.s32 0, %v2_v0 }
   0x4   :  { %7 = vst [vmem:[%s25_s1] sm:$0x1] %v5_v1 }

// kernel: forward.1
= control target key start
LH: loop header
LB: loop body
LE: loop exit
PB: predicated region body
PF: predicated region fallthrough
CT: control target
= control target key end

     0   :  { %s3119_s0 = inlined_call_operand.vmem [shape: f32[16,32], index: 0, kind: input, shape index: {}]   ;;  %s3120_s1 = inlined_call_operand.vmem [shape: f32[14,32], index: 1, kind: input, shape index: {}]   ;;  %s3121_s2 = inlined_call_operand.vmem [shape: s32[2,1], index: 2, kind: input, shape index: {}]   ;;  %s3122_s3 = inlined_call_operand.vmem [shape: f32[2,16], index: 3, kind: input, shape index: {}]   ;;  %s3123_s4 = inlined_call_operand.vmem [shape: f32[32,32], index: 4, kind: input, shape index: {}]   ;;  %s3124_s5 = inlined_call_operand.vmem [shape: f32[32,32], index: 5, kind: input, shape index: {}]   ;;  %s3125_s6 = inlined_call_operand.vmem [shape: f32[1,32], index: 6, kind: input, shape index: {}]   ;;  %s3126_s7 = inlined_call_operand.vmem [shape: f32[32,32], index: 7, kind: input, shape index: {}]   ;;  %s3127_s8 = inlined_call_operand.vmem [shape: f32[32,32], index: 8, kind: input, shape index: {}]   ;;  %s3128_s9 = inlined_call_operand.vmem [shape: f32[1,32], index: 9, kind: input, shape index: {}]   ;;  %s3129_s10 = inlined_call_operand.vmem [shape: f32[32,16], index: 10, kind: input, shape index: {}]   ;;  %s3130_s11 = inlined_call_operand.vmem [shape: f32[1,16], index: 11, kind: input, shape index: {}]   ;;  %s3131_s12 = inlined_call_operand.vmem [shape: f32[32,16], index: 12, kind: input, shape index: {}]   ;;  %s3132_s13 = inlined_call_operand.vmem [shape: f32[1,16], index: 13, kind: input, shape index: {}]   ;;  %s3133_s14 = inlined_call_operand.vmem [shape: f32[16,32], index: 14, kind: input, shape index: {}]   ;;  %s3134_s15 = inlined_call_operand.vmem [shape: f32[1,32], index: 15, kind: input, shape index: {}]   ;;  %s3135_s16 = inlined_call_operand.vmem [shape: f32[32,64], index: 16, kind: input, shape index: {}]   ;;  %s3136_s17 = inlined_call_operand.vmem [shape: f32[1,64], index: 17, kind: input, shape index: {}]   ;;  %s3137_s18 = inlined_call_operand.vmem [shape: f32[64,128], index: 18, kind: input, shape index: {}]   ;;  %s3138_s19 = inlined_call_operand.vmem [shape: f32[1,128], index: 19, kind: input, shape index: {}]   ;;  %s3139_s20 = inlined_call_operand.hbm [shape: f32[14,128], index: 20, kind: output, shape index: {0}]   ;;  %s3140_s21 = inlined_call_operand.vmem [shape: f32[2,16], index: 21, kind: output, shape index: {1}]   ;;  %s3141_s22 = inlined_call_operand.vmem [shape: f32[2,16], index: 22, kind: output, shape index: {2}]  }
   0x1   :  { %3146 = sst [smem:[#allocation6_spill]] %s3119_s0 }
   0x2   :  { %3147 = sst [smem:[#allocation7_spill]] %s3120_s1 }
   0x3   :  { %3148 = sst [smem:[#allocation8_spill]] %s3121_s2 }
   0x4   :  { %3149 = sst [smem:[#allocation9_spill]] %s3122_s3 }
   0x5   :  { %3150 = sst [smem:[#allocation10_spill]] %s3123_s4 }
   0x6   :  { %3151 = sst [smem:[#allocation11_spill]] %s3124_s5 }
   0x7   :  { %3152 = sst [smem:[#allocation12_spill]] %s3125_s6 }
   0x8   :  { %s3153_s29 = sld [smem:[#allocation10_spill]]  ;;  %vm91_vm0 = vcmask 261120   ;;  %v2555_v3 = vmov 0.0   ;;  %v2556_v5 = vmov 0   ;;  %vm2557_vm1 = vmmov 0  }
   0x9   :  { %s3154_s1 = sld [smem:[#allocation6_spill]]  ;;  %2272 = vmatprep.subr.mxu1 %v2555_v3  ;;  %2491 = vset.pattern.permute.xlu0 %v2556_v5 }
   0xa   :  { %s3155_s27 = sld [smem:[#allocation11_spill]]  ;;  %2280 = vmatprep.mubr.msk.f32.mxu1 %vm2557_vm1, %v2555_v3 }
   0xb   :  { %s3156_s30 = sld [smem:[#allocation8_spill]] }
   0xe   :  { %v83_v0 = vld [vmem:[%s3153_s29 + $0x18] sm:$0xff]  ;;  %v82_v1 = vld [vmem:[%s3153_s29 + $0x10] sm:$0xff]  ;;  %v81_v4 = vld [vmem:[%s3153_s29 + $0x8] sm:$0xff] }
   0xf   :  { %2239 = vmatprep.subr.mxu0 %v83_v0  ;;  %v78_v2 = vld [vmem:[%s3154_s1] sm:$0xff] }
  0x10   :  { %2240 = vmatpush3.msra.mxu0 %v83_v0  ;;  %2247 = vmatprep.mubr.msk.f32.mxu0 %vm91_vm0, %v78_v2  ;;  %v80_v6 = vld [vmem:[%s3153_s29] sm:$0xff]  ;;  %v2697_v7 = vld [vmem:[%s3155_s27 + $0x18] sm:$0xff] }
  0x11   :  { %2241 = vmatprep.subr.mxu0 %v82_v1  ;;  %v2704_v8 = vld [vmem:[%s3156_s30] sm:$0x3]  ;;  %2273 = vmatpush3.msra.mxu1 %v2697_v7 }
  0x12   :  { %2242 = vmatpush3.msra.mxu0 %v82_v1 }
  0x13   :  { %2243 = vmatprep.subr.mxu0 %v81_v4 }
  0x14   :  { %28 = vsyncpa [#allocation4], 0  ;;  %2244 = vmatpush3.msra.mxu0 %v81_v4  ;;  %v79_v9 = vld [vmem:[%s3154_s1 + $0x8] sm:$0xff]  ;;  %v178_v10 = vld [vmem:[%s3126_s7 + $0x18] sm:$0xff]  ;;  %vm342_vm2 = vcmp.gt.s32.totalorder %v2704_v8, 0  ;;  %vm427_vm3 = vcmp.gt.s32.totalorder %v2704_v8, 1  ;;  %2274 = vmatprep.subr.mxu1 %v2555_v3 }
  0x15   :  { %v2716_v11 = vld [vmem:[%s3155_s27 + $0x10] sm:$0xff]  ;;  %2245 = vmatprep.subr.mxu0 %v80_v6  ;;  %s3157_s26 = sld [smem:[#allocation7_spill]]  ;;  %v343_v13 = vsel %vm342_vm2, 1, %v2556_v5  ;;  %v428_v15 = vsel %vm427_vm3, 1, %v2556_v5  ;;  %v176_v16 = vld [vmem:[%s3126_s7 + $0x8] sm:$0xff]  ;;  %vm688_vm4 = vcmp.gt.s32.totalorder %v2704_v8, 4  ;;  %2492 = vset.pattern.permute.xlu1 %v2556_v5 }
  0x16   :  { %2275 = vmatpush3.msra.mxu1 %v2716_v11  ;;  %2246 = vmatpush3.msra.mxu0 %v80_v6  ;;  %v177_v14 = vld [vmem:[%s3126_s7 + $0x10] sm:$0xff]  ;;  %v175_v17 = vld [vmem:[%s3126_s7] sm:$0xff]  ;;  %v2743_v18 = vld [vmem:[%s3155_s27 + $0x8] sm:$0xff]  ;;  %v689_v19 = vsel %vm688_vm4, 1, %v2556_v5  ;;  %vm861_vm5 = vcmp.gt.s32.totalorder %v2704_v8, 6  ;;  %v2757_v22 = vadd.s32 4294967295, %v2704_v8 }
  0x17   :  { %345 = vperm.xlu0 %2491, %v343_v13   ;;  %2248 = vmatmul.mubr.msk.f32.vlgmr.msra.gmra.mxu0 %vm91_vm0, %v79_v9  ;;  %v2753_v21 = vld [vmem:[%s3155_s27] sm:$0xff]  ;;  %v862_v23 = vsel %vm861_vm5, 1, %v2556_v5  ;;  %s3158_s25 = sld [smem:[#allocation12_spill]]  ;;  %vm515_vm11 = vcmp.gt.s32.totalorder %v2704_v8, 2  ;;  %vm603_vm12 = vcmp.gt.s32.totalorder %v2704_v8, 3  ;;  %vm773_vm13 = vcmp.gt.s32.totalorder %v2704_v8, 5 }
  0x18   :  { %2250 = vmatprep.subr.mxu0 %v178_v10  ;;  %2276 = vmatprep.subr.mxu1 %v2555_v3  ;;  %vm1293_vm6 = vcmp.gt.s32.totalorder %v2757_v22, 0  ;;  %vm1471_vm7 = vcmp.gt.s32.totalorder %v2757_v22, 2  ;;  %vm1648_vm8 = vcmp.gt.s32.totalorder %v2757_v22, 4  ;;  %vm1825_vm9 = vcmp.gt.s32.totalorder %v2757_v22, 6  ;;  %v2803_v32 = vld [vmem:[%s3128_s9] ss:$0 sm:$0xff] }
  0x19   :  { %2251 = vmatpush3.msra.mxu0 %v178_v10  ;;  %2277 = vmatpush3.msra.mxu1 %v2743_v18  ;;  %v1294_v24 = vsel %vm1293_vm6, 1, %v2556_v5  ;;  %v1472_v25 = vsel %vm1471_vm7, 1, %v2556_v5  ;;  %v1649_v26 = vsel %vm1648_vm8, 1, %v2556_v5  ;;  %v1826_v27 = vsel %vm1825_vm9, 1, %v2556_v5  ;;  %s3159_s24 = sld [smem:[#allocation9_spill]] }
  0x1a   :  { %2252 = vmatprep.subr.mxu0 %v177_v14  ;;  %2278 = vmatprep.subr.mxu1 %v2555_v3  ;;  %v516_v43 = vsel %vm515_vm11, 1, %v2556_v5  ;;  %v604_v44 = vsel %vm603_vm12, 1, %v2556_v5  ;;  %v774_v45 = vsel %vm773_vm13, 1, %v2556_v5  ;;  %vm949_vm14 = vcmp.gt.s32.totalorder %v2704_v8, 7 }
  0x1b   :  { %v173_v12 = vld [vmem:[%s3157_s26] sm:$0xff]  ;;  %2253 = vmatpush3.msra.mxu0 %v177_v14  ;;  %430 = vperm.xlu0 %2491, %v428_v15   ;;  %v174_v20 = vld [vmem:[%s3157_s26 + $0x8] sm:$0x3f]  ;;  %v950_v46 = vsel %vm949_vm14, 1, %v2556_v5  ;;  %vm1381_vm15 = vcmp.gt.s32.totalorder %v2757_v22, 1  ;;  %vm1561_vm2 = vcmp.gt.s32.totalorder %v2757_v22, 3 }
  0x1c   :  { %2258 = vmatprep.mubr.msk.f32.mxu0 %vm91_vm0, %v173_v12  ;;  %2254 = vmatprep.subr.mxu0 %v176_v16  ;;  %v1382_v47 = vsel %vm1381_vm15, 1, %v2556_v5  ;;  %v1562_v48 = vsel %vm1561_vm2, 1, %v2556_v5  ;;  %vm1735_vm3 = vcmp.gt.s32.totalorder %v2757_v22, 5  ;;  %vm1124_vm11 = vcmask 123904  }
  0x1d   :  { %2255 = vmatpush3.msra.mxu0 %v176_v16  ;;  %2279 = vmatpush3.msra.mxu1 %v2753_v21  ;;  %v2090_v28 = vld [vmem:[%s3158_s25] ss:$0 sm:$0xff]  ;;  %v1736_v49 = vsel %vm1735_vm3, 1, %v2556_v5  ;;  %vm1142_vm12 = vcmask 130048   ;;  %vm1301_vm13 = vcmask 254976  }
  0x1e   :  { %2256 = vmatprep.subr.mxu0 %v175_v17  ;;  %2294 = vmatprep.subr.mxu1 %v2555_v3 }
  0x1f   :  { %2257 = vmatpush3.msra.mxu0 %v175_v17  ;;  %691 = vperm.xlu0 %2491, %v689_v19  }
  0x20   :  { %2259 = vmatmul.mubr.msk.f32.vlgmr.msra.gmra.mxu0 %vm91_vm0, %v174_v20  ;;  %2261 = vmatprep.subr.mxu0 %v2555_v3 }
  0x21   :  { %2262 = vmatpush3.msra.mxu0 %v2697_v7  ;;  %2269 = vmatprep.mubr.msk.f32.mxu0 %vm2557_vm1, %v2555_v3 }
  0x22   :  { %2263 = vmatprep.subr.mxu0 %v2555_v3  ;;  %518 = vperm.xlu1 %2492, %v516_v43   ;;  %v959_v43 = vld [vmem:[%s3129_s10] sm:$0xff] }
  0x23   :  { %2264 = vmatpush3.msra.mxu0 %v2716_v11  ;;  %864 = vperm.xlu0 %2491, %v862_v23  }
  0x24   :  { %2265 = vmatprep.subr.mxu0 %v2555_v3 }
  0x25   :  { %2266 = vmatpush3.msra.mxu0 %v2743_v18 }
  0x26   :  { %2267 = vmatprep.subr.mxu0 %v2555_v3  ;;  %606 = vperm.xlu1 %2492, %v604_v44   ;;  %v1043_v44 = vld [vmem:[%s3131_s12] sm:$0xff] }
  0x27   :  { %2268 = vmatpush3.msra.mxu0 %v2753_v21  ;;  %1296 = vperm.xlu0 %2491, %v1294_v24  }
  0x28   :  { %2270 = vmatmul.mubr.f32.vlgmr.msra.gmra.mxu0 %v2555_v3  ;;  %2283 = vmatprep.subr.mxu0 %v2555_v3 }
  0x29   :  { %2284 = vmatpush3.msra.mxu0 %v2697_v7  ;;  %2291 = vmatprep.mubr.msk.f32.mxu0 %vm2557_vm1, %v2555_v3 }
  0x2a   :  { %2285 = vmatprep.subr.mxu0 %v2555_v3  ;;  %776 = vperm.xlu1 %2492, %v774_v45  }
  0x2b   :  { %1474 = vperm.xlu0 %2491, %v1472_v25   ;;  %2286 = vmatpush3.msra.mxu0 %v2716_v11 }
  0x2c   :  { %2287 = vmatprep.subr.mxu0 %v2555_v3 }
  0x2d   :  { %2288 = vmatpush3.msra.mxu0 %v2743_v18 }
  0x2e   :  { %2289 = vmatprep.subr.mxu0 %v2555_v3  ;;  %952 = vperm.xlu1 %2492, %v950_v46  }
  0x2f   :  { %1651 = vperm.xlu0 %2491, %v1649_v26   ;;  %2290 = vmatpush3.msra.mxu0 %v2753_v21 }
  0x30   :  { %2305 = vmatprep.subr.mxu0 %v2555_v3 }
  0x32   :  { %1384 = vperm.xlu1 %2492, %v1382_v47  }
  0x33   :  { %1828 = vperm.xlu0 %2491, %v1826_v27  }
  0x36   :  { %1564 = vperm.xlu1 %2492, %v1562_v48  }
  0x3a   :  { %1738 = vperm.xlu1 %2492, %v1736_v49  }
  0x92   :  { %v346_v40 = vpop.permute.xlu0 %345 }
  0x93   :  { %vm347_vm10 = vcmp.eq.s32.totalorder %v346_v40, 1  ;;  %v1045_v40 = vld [vmem:[%s3131_s12 + $0x10] sm:$0xff] }
  0x96   :  { %v431_v55 = vpop.permute.xlu0 %430 }
  0x97   :  { %vm432_vm4 = vcmp.eq.s32.totalorder %v431_v55, 1  ;;  %v2103_v55 = vld [vmem:[%s3130_s11] ss:$0 sm:$0xff] }
  0x9a   :  { %v692_v16 = vpop.permute.xlu0 %691 }
  0x9b   :  { %vm693_vm7 = vcmp.eq.s32.totalorder %v692_v16, 1 }
  0x9d   :  { %v519_v62 = vpop.permute.xlu1 %518 }
  0x9e   :  { %vm520_vm5 = vcmp.eq.s32.totalorder %v519_v62, 1 }
  0xa1   :  { %v607_v9 = vpop.permute.xlu1 %606 }
  0xa2   :  { %vm608_vm6 = vcmp.eq.s32.totalorder %v607_v9, 1  ;;  %v2987_v9 = vld [vmem:[%s3127_s8] sm:$0xff] }
  0xa5   :  { %v777_v25 = vpop.permute.xlu1 %776 }
  0xa6   :  { %vm778_vm8 = vcmp.eq.s32.totalorder %v777_v25, 1 }
  0xd7   :  { %v2249_v29 = vpop.f32.mrf.mxu0 }
  0xd8   :  { %v2798_v30 = vadd.f32 %v2249_v29, %v2090_v28 }
  0xd9   :  { %v164_v31 = vpop.f32.mrf.mxu0 }
  0xda   :  { %v2810_v36 = vadd.f32 %v2090_v28, %v164_v31  ;;  %v865_v31 = vpop.permute.xlu0 %864 }
  0xdb   :  { %vm866_vm9 = vcmp.eq.s32.totalorder %v865_v31, 1 }
  0xe0   :  { %v2260_v33 = vpop.f32.mrf.mxu0 }
  0xe1   :  { %v2806_v34 = vadd.f32 %v2260_v33, %v2803_v32 }
  0xe2   :  { %v2808_v35 = vpop.f32.mrf.mxu0 }
  0xe3   :  { %v3010_v16 = vadd.f32 %v2803_v32, %v2808_v35 }
  0xe8   :  { %v336_v37 = vpop.f32.mrf.mxu0 }
  0xe9   :  { %v340_v38 = vadd.f32 %v336_v37, %v2810_v36  ;;  %v962_v37 = vld [vmem:[%s3129_s10 + $0x18] sm:$0xff] }
  0xea   :  { %v2271_v39 = vpop.f32.mrf.mxu0 }
  0xeb   :  { %2493 = vtanh.f32 %v340_v38  ;;  %v1046_v38 = vld [vmem:[%s3131_s12 + $0x18] sm:$0xff]  ;;  %v961_v39 = vld [vmem:[%s3129_s10 + $0x10] sm:$0xff] }
  0xf8   :  { %v2494_v41 = vpop.eup %2493 }
  0xf9   :  { %v348_v42 = vsel %vm347_vm10, %v2494_v41, 0.0  ;;  %v960_v41 = vld [vmem:[%s3129_s10 + $0x8] sm:$0xff] }
  0xfa   :  { %2281 = vmatmul.mubr.msk.f32.vlgmr.msra.gmra.mxu1 %vm91_vm0, %v348_v42 }
  0xfb   :  { %2295 = vmatpush3.msra.mxu1 %v2697_v7  ;;  %2302 = vmatprep.mubr.msk.f32.mxu1 %vm2557_vm1, %v2555_v3 }
  0xfc   :  { %2296 = vmatprep.subr.mxu1 %v2555_v3 }
  0xfd   :  { %2297 = vmatpush3.msra.mxu1 %v2716_v11 }
  0xfe   :  { %2298 = vmatprep.subr.mxu1 %v2555_v3 }
  0xff   :  { %2299 = vmatpush3.msra.mxu1 %v2743_v18 }
 0x100   :  { %2300 = vmatprep.subr.mxu1 %v2555_v3 }
 0x101   :  { %2301 = vmatpush3.msra.mxu1 %v2753_v21 }
 0x102   :  { %2316 = vmatprep.subr.mxu1 %v2555_v3 }
 0x1ba   :  { %v418_v50 = vpop.f32.mrf.mxu1 }
 0x1bb   :  { %v423_v51 = vrot.slane %v418_v50, 6  ;;  %v953_v50 = vpop.permute.xlu1 %952 }
 0x1bc   :  { %v2282_v52 = vpop.f32.mrf.mxu1  ;;  %vm954_vm10 = vcmp.eq.s32.totalorder %v953_v50, 1 }
 0x1bd   :  { %v425_v53 = vadd.f32 %v423_v51, %v2810_v36 }
 0x1bf   :  { %2495 = vtanh.f32 %v425_v53  ;;  %v1133_v53 = vld [vmem:[%s3133_s14] sm:$0xff] }
 0x1cc   :  { %v2496_v54 = vpop.eup %2495 }
 0x1cd   :  { %v434_v56 = vrot.slane %v2496_v54, 2  ;;  %v2944_v54 = vld [vmem:[%s3127_s8 + $0x18] sm:$0xff] }
 0x1cf   :  { %v436_v57 = vsel %vm432_vm4, %v434_v56, %v348_v42  ;;  %v1044_v42 = vld [vmem:[%s3131_s12 + $0x8] sm:$0xff]  ;;  %v2105_v56 = vld [vmem:[%s3132_s13] ss:$0 sm:$0xff] }
 0x1d0   :  { %2292 = vmatmul.mubr.msk.f32.vlgmr.msra.gmra.mxu0 %vm91_vm0, %v436_v57 }
 0x1d1   :  { %2306 = vmatpush3.msra.mxu0 %v2697_v7  ;;  %2313 = vmatprep.mubr.msk.f32.mxu0 %vm2557_vm1, %v2555_v3 }
 0x1d2   :  { %2307 = vmatprep.subr.mxu0 %v2555_v3 }
 0x1d3   :  { %2308 = vmatpush3.msra.mxu0 %v2716_v11 }
 0x1d4   :  { %2309 = vmatprep.subr.mxu0 %v2555_v3 }
 0x1d5   :  { %2310 = vmatpush3.msra.mxu0 %v2743_v18 }
 0x1d6   :  { %2311 = vmatprep.subr.mxu0 %v2555_v3 }
 0x1d7   :  { %2312 = vmatpush3.msra.mxu0 %v2753_v21 }
 0x1d8   :  { %2327 = vmatprep.subr.mxu0 %v2555_v3 }
 0x290   :  { %v506_v58 = vpop.f32.mrf.mxu0 }
 0x291   :  { %v511_v59 = vrot.slane %v506_v58, 4 }
 0x292   :  { %v2293_v60 = vpop.f32.mrf.mxu0 }
 0x293   :  { %v513_v61 = vadd.f32 %v511_v59, %v2810_v36 }
 0x295   :  { %2497 = vtanh.f32 %v513_v61 }
 0x2a2   :  { %v2498_v63 = vpop.eup %2497 }
 0x2a3   :  { %v522_v0 = vrot.slane %v2498_v63, 4 }
 0x2a5   :  { %v524_v1 = vsel %vm520_vm5, %v522_v0, %v436_v57 }
 0x2a6   :  { %2303 = vmatmul.mubr.msk.f32.vlgmr.msra.gmra.mxu1 %vm91_vm0, %v524_v1 }
 0x2a7   :  { %2317 = vmatpush3.msra.mxu1 %v2697_v7  ;;  %2324 = vmatprep.mubr.msk.f32.mxu1 %vm2557_vm1, %v2555_v3 }
 0x2a8   :  { %2318 = vmatprep.subr.mxu1 %v2555_v3 }
 0x2a9   :  { %2319 = vmatpush3.msra.mxu1 %v2716_v11 }
 0x2aa   :  { %2320 = vmatprep.subr.mxu1 %v2555_v3 }
 0x2ab   :  { %2321 = vmatpush3.msra.mxu1 %v2743_v18 }
 0x2ac   :  { %2322 = vmatprep.subr.mxu1 %v2555_v3 }
 0x2ad   :  { %2323 = vmatpush3.msra.mxu1 %v2753_v21 }
 0x2ae   :  { %2338 = vmatprep.subr.mxu1 %v2555_v3 }
 0x366   :  { %v594_v2 = vpop.f32.mrf.mxu1 }
 0x367   :  { %v599_v4 = vrot.slane %v594_v2, 2 }
 0x368   :  { %v2304_v5 = vpop.f32.mrf.mxu1 }
 0x369   :  { %v601_v6 = vadd.f32 %v599_v4, %v2810_v36 }
 0x36b   :  { %2499 = vtanh.f32 %v601_v6  ;;  %v2970_v6 = vld [vmem:[%s3127_s8 + $0x10] sm:$0xff] }
 0x378   :  { %v2500_v8 = vpop.eup %2499 }
 0x379   :  { %v610_v10 = vrot.slane %v2500_v8, 6  ;;  %v2978_v8 = vld [vmem:[%s3127_s8 + $0x8] sm:$0xff] }
 0x37b   :  { %v612_v12 = vsel %vm608_vm6, %v610_v10, %v524_v1  ;;  %v1127_v1 = vld [vmem:[%s3159_s24] sm:$0x3]  ;;  %vm2031_vm6 = vcmask 1045504  }
 0x37c   :  { %2314 = vmatmul.mubr.msk.f32.vlgmr.msra.gmra.mxu0 %vm91_vm0, %v612_v12  ;;  %v2107_v10 = vld [vmem:[%s3134_s15] ss:$0 sm:$0xff] }
 0x37d   :  { %2328 = vmatpush3.msra.mxu0 %v2697_v7  ;;  %2335 = vmatprep.mubr.msk.f32.mxu0 %vm2557_vm1, %v2555_v3 }
 0x37e   :  { %2329 = vmatprep.subr.mxu0 %v2555_v3 }
 0x37f   :  { %2330 = vmatpush3.msra.mxu0 %v2716_v11 }
 0x380   :  { %2331 = vmatprep.subr.mxu0 %v2555_v3 }
 0x381   :  { %2332 = vmatpush3.msra.mxu0 %v2743_v18 }
 0x382   :  { %2333 = vmatprep.subr.mxu0 %v2555_v3 }
 0x383   :  { %2334 = vmatpush3.msra.mxu0 %v2753_v21 }
 0x384   :  { %2349 = vmatprep.subr.mxu0 %v2555_v3 }
 0x43c   :  { %v682_v13 = vpop.f32.mrf.mxu0 }
 0x43d   :  { %v686_v14 = vadd.f32 %v682_v13, %v2798_v30 }
 0x43e   :  { %v2315_v15 = vpop.f32.mrf.mxu0 }
 0x43f   :  { %2501 = vtanh.f32 %v686_v14 }
 0x44c   :  { %v2502_v17 = vpop.eup %2501 }
 0x44d   :  { %v694_v19 = vsel %vm693_vm7, %v2502_v17, %v612_v12 }
 0x44e   :  { %2325 = vmatmul.mubr.msk.f32.vlgmr.msra.gmra.mxu1 %vm91_vm0, %v694_v19 }
 0x44f   :  { %2339 = vmatpush3.msra.mxu1 %v2697_v7  ;;  %2346 = vmatprep.mubr.msk.f32.mxu1 %vm2557_vm1, %v2555_v3 }
 0x450   :  { %2340 = vmatprep.subr.mxu1 %v2555_v3 }
 0x451   :  { %2341 = vmatpush3.msra.mxu1 %v2716_v11 }
 0x452   :  { %2342 = vmatprep.subr.mxu1 %v2555_v3 }
 0x453   :  { %2343 = vmatpush3.msra.mxu1 %v2743_v18 }
 0x454   :  { %2344 = vmatprep.subr.mxu1 %v2555_v3 }
 0x455   :  { %2345 = vmatpush3.msra.mxu1 %v2753_v21 }
 0x456   :  { %2360 = vmatprep.subr.mxu1 %v2555_v3 }
 0x50e   :  { %v764_v20 = vpop.f32.mrf.mxu1 }
 0x50f   :  { %v769_v22 = vrot.slane %v764_v20, 6 }
 0x510   :  { %v2326_v7 = vpop.f32.mrf.mxu1 }
 0x511   :  { %v771_v23 = vadd.f32 %v769_v22, %v2798_v30  ;;  %v1297_v22 = vpop.permute.xlu0 %1296 }
 0x512   :  { %vm1298_vm14 = vcmp.eq.s32.totalorder %v1297_v22, 1 }
 0x513   :  { %2503 = vtanh.f32 %v771_v23 }
 0x520   :  { %v2504_v24 = vpop.eup %2503 }
 0x521   :  { %v780_v26 = vrot.slane %v2504_v24, 2 }
 0x523   :  { %v782_v11 = vsel %vm778_vm8, %v780_v26, %v694_v19 }
 0x524   :  { %2336 = vmatmul.mubr.msk.f32.vlgmr.msra.gmra.mxu0 %vm91_vm0, %v782_v11 }
 0x525   :  { %2357 = vmatprep.mubr.msk.f32.mxu0 %vm2557_vm1, %v2555_v3  ;;  %2350 = vmatpush3.msra.mxu0 %v962_v37 }
 0x526   :  { %2351 = vmatprep.subr.mxu0 %v2555_v3 }
 0x527   :  { %2352 = vmatpush3.msra.mxu0 %v961_v39 }
 0x528   :  { %2353 = vmatprep.subr.mxu0 %v2555_v3 }
 0x529   :  { %2354 = vmatpush3.msra.mxu0 %v960_v41 }
 0x52a   :  { %2355 = vmatprep.subr.mxu0 %v2555_v3 }
 0x52b   :  { %2356 = vmatpush3.msra.mxu0 %v959_v43 }
 0x52c   :  { %2371 = vmatprep.subr.mxu0 %v2555_v3 }
 0x5e4   :  { %v852_v18 = vpop.f32.mrf.mxu0 }
 0x5e5   :  { %v857_v21 = vrot.slane %v852_v18, 4  ;;  %v1385_v18 = vpop.permute.xlu1 %1384 }
 0x5e6   :  { %v2337_v27 = vpop.f32.mrf.mxu0  ;;  %vm1386_vm15 = vcmp.eq.s32.totalorder %v1385_v18, 1 }
 0x5e7   :  { %v859_v28 = vadd.f32 %v857_v21, %v2798_v30 }
 0x5e9   :  { %2505 = vtanh.f32 %v859_v28 }
 0x5f6   :  { %v2506_v29 = vpop.eup %2505 }
 0x5f7   :  { %v868_v33 = vrot.slane %v2506_v29, 4 }
 0x5f9   :  { %v870_v36 = vsel %vm866_vm9, %v868_v33, %v782_v11 }
 0x5fa   :  { %2347 = vmatmul.mubr.msk.f32.vlgmr.msra.gmra.mxu1 %vm91_vm0, %v870_v36 }
 0x5fb   :  { %2368 = vmatprep.mubr.msk.f32.mxu1 %vm2557_vm1, %v2555_v3  ;;  %2361 = vmatpush3.msra.mxu1 %v1046_v38  ;;  %v1475_v38 = vpop.permute.xlu0 %1474 }
 0x5fc   :  { %2362 = vmatprep.subr.mxu1 %v2555_v3  ;;  %vm1476_vm2 = vcmp.eq.s32.totalorder %v1475_v38, 1 }
 0x5fd   :  { %2363 = vmatpush3.msra.mxu1 %v1045_v40 }
 0x5fe   :  { %2364 = vmatprep.subr.mxu1 %v2555_v3 }
 0x5ff   :  { %2365 = vmatpush3.msra.mxu1 %v1044_v42 }
 0x600   :  { %2366 = vmatprep.subr.mxu1 %v2555_v3 }
 0x601   :  { %2367 = vmatpush3.msra.mxu1 %v1043_v44 }
 0x602   :  { %2378 = vmatprep.subr.mxu1 %v2555_v3 }
 0x6ba   :  { %v940_v45 = vpop.f32.mrf.mxu1 }
 0x6bb   :  { %v945_v46 = vrot.slane %v940_v45, 2 }
 0x6bc   :  { %v2348_v47 = vpop.f32.mrf.mxu1 }
 0x6bd   :  { %v947_v48 = vadd.f32 %v945_v46, %v2798_v30  ;;  %v1134_v30 = vld [vmem:[%s3133_s14 + $0x8] sm:$0xff]  ;;  %v1565_v47 = vpop.permute.xlu1 %1564 }
 0x6be   :  { %vm1566_vm3 = vcmp.eq.s32.totalorder %v1565_v47, 1 }
 0x6bf   :  { %2507 = vtanh.f32 %v947_v48 }
 0x6cc   :  { %v2508_v49 = vpop.eup %2507 }
 0x6cd   :  { %v956_v51 = vrot.slane %v2508_v49, 6 }
 0x6cf   :  { %v958_v52 = vsel %vm954_vm10, %v956_v51, %v870_v36 }
 0x6d0   :  { %2358 = vmatmul.mubr.msk.f32.vlgmr.msra.gmra.mxu0 %vm91_vm0, %v958_v52  ;;  %2369 = vmatmul.mubr.msk.f32.vlgmr.msra.gmra.mxu1 %vm91_vm0, %v958_v52 }
 0x6d1   :  { %2375 = vmatprep.mubr.msk.f32.mxu0 %vm2557_vm1, %v2555_v3  ;;  %2386 = vmatprep.mubr.msk.f32.mxu1 %vm2557_vm1, %v2555_v3 }
 0x6d2   :  { %2372 = vmatpush3.msra.mxu0 %v1134_v30  ;;  %2379 = vmatpush3.msra.mxu1 %v2944_v54 }
 0x6d3   :  { %2373 = vmatprep.subr.mxu0 %v2555_v3  ;;  %2380 = vmatprep.subr.mxu1 %v2555_v3 }
 0x6d4   :  { %2374 = vmatpush3.msra.mxu0 %v1133_v53  ;;  %2381 = vmatpush3.msra.mxu1 %v2970_v6  ;;  %v1652_v53 = vpop.permute.xlu0 %1651 }
 0x6d5   :  { %2389 = vmatprep.subr.mxu0 %v2555_v3  ;;  %2382 = vmatprep.subr.mxu1 %v2555_v3 }
 0x6d6   :  { %2383 = vmatpush3.msra.mxu1 %v2978_v8 }
 0x6d7   :  { %2384 = vmatprep.subr.mxu1 %v2555_v3 }
 0x6d8   :  { %2385 = vmatpush3.msra.mxu1 %v2987_v9 }
 0x6d9   :  { %2400 = vmatprep.subr.mxu1 %v2555_v3 }
 0x790   :  { %v1039_v57 = vpop.f32.mrf.mxu0  ;;  %v1120_v58 = vpop.f32.mrf.mxu1 }
 0x791   :  { %v1040_v59 = vadd.f32 %v2103_v55, %v1039_v57  ;;  %v1121_v60 = vadd.f32 %v2105_v56, %v1120_v58 }
 0x792   :  { %v2359_v61 = vpop.f32.mrf.mxu0  ;;  %v2370_v62 = vpop.f32.mrf.mxu1 }
 0x793   :  { %1125 = vst.msk [vmem:[%s3140_s21] sm:$0x3] %vm1124_vm11, %v1040_v59  ;;  %1126 = vst.msk [vmem:[%s3141_s22] sm:$0x3] %vm1124_vm11, %v1121_v60  ;;  %v1128_v63 = vmul.f32 0.5, %v1121_v60  ;;  %v1739_v61 = vpop.permute.xlu1 %1738 }
 0x794   :  { %vm1740_vm4 = vcmp.eq.s32.totalorder %v1739_v61, 1 }
 0x795   :  { %v1129_v0 = vmul.f32 1.442695, %v1128_v63 }
 0x797   :  { %2509 = vpow2.f32 %v1129_v0 }
 0x7a4   :  { %v2510_v2 = vpop.eup %2509 }
 0x7a5   :  { %v1131_v4 = vmul.f32 %v2510_v2, %v1127_v1  ;;  %v1841_v2 = vld [vmem:[%s3135_s16 + $0x18] sm:$0xff] }
 0x7a7   :  { %v1132_v5 = vadd.f32 %v1131_v4, %v1040_v59  ;;  %v1840_v4 = vld [vmem:[%s3135_s16 + $0x10] sm:$0xff] }
 0x7a9   :  { %2376 = vmatmul.mubr.msk.f32.vlgmr.msra.gmra.mxu0 %vm1142_vm12, %v1132_v5  ;;  %v1839_v5 = vld [vmem:[%s3135_s16 + $0x8] sm:$0xff] }
 0x7aa   :  { %2390 = vmatpush3.msra.mxu0 %v2944_v54  ;;  %2397 = vmatprep.mubr.msk.f32.mxu0 %vm2557_vm1, %v2555_v3 }
 0x7ab   :  { %2391 = vmatprep.subr.mxu0 %v2555_v3 }
 0x7ac   :  { %2392 = vmatpush3.msra.mxu0 %v2970_v6 }
 0x7ad   :  { %2393 = vmatprep.subr.mxu0 %v2555_v3 }
 0x7ae   :  { %2394 = vmatpush3.msra.mxu0 %v2978_v8 }
 0x7af   :  { %2395 = vmatprep.subr.mxu0 %v2555_v3 }
 0x7b0   :  { %2396 = vmatpush3.msra.mxu0 %v2987_v9 }
 0x7b1   :  { %2411 = vmatprep.subr.mxu0 %v2555_v3 }
 0x869   :  { %v1212_v12 = vpop.f32.mrf.mxu0 }
 0x86a   :  { %v1213_v13 = vadd.f32 %v2107_v10, %v1212_v12  ;;  %v1937_v10 = vld [vmem:[%s3137_s18 + $0x28] sm:$0xff]  ;;  %v1936_v12 = vld [vmem:[%s3137_s18 + $0x20] sm:$0xff] }
 0x86b   :  { %v2377_v14 = vpop.f32.mrf.mxu0 }
 0x86c   :  { %v1216_v15 = vadd.f32 %v1213_v13, %v958_v52 }
 0x86e   :  { %2387 = vmatmul.mubr.msk.f32.vlgmr.msra.gmra.mxu1 %vm91_vm0, %v1216_v15 }
 0x86f   :  { %2401 = vmatpush3.msra.mxu1 %v2944_v54  ;;  %2408 = vmatprep.mubr.msk.f32.mxu1 %vm2557_vm1, %v2555_v3 }
 0x870   :  { %2402 = vmatprep.subr.mxu1 %v2555_v3 }
 0x871   :  { %2403 = vmatpush3.msra.mxu1 %v2970_v6 }
 0x872   :  { %2404 = vmatprep.subr.mxu1 %v2555_v3 }
 0x873   :  { %2405 = vmatpush3.msra.mxu1 %v2978_v8 }
 0x874   :  { %2406 = vmatprep.subr.mxu1 %v2555_v3 }
 0x875   :  { %2407 = vmatpush3.msra.mxu1 %v2987_v9 }
 0x876   :  { %2422 = vmatprep.subr.mxu1 %v2555_v3 }
 0x92e   :  { %v1287_v17 = vpop.f32.mrf.mxu1 }
 0x92f   :  { %v1291_v19 = vadd.f32 %v1287_v17, %v3010_v16  ;;  %v1829_v17 = vpop.permute.xlu0 %1828 }
 0x930   :  { %v2388_v20 = vpop.f32.mrf.mxu1  ;;  %vm1830_vm5 = vcmp.eq.s32.totalorder %v1829_v17, 1 }
 0x931   :  { %2511 = vtanh.f32 %v1291_v19 }
 0x93e   :  { %v2512_v7 = vpop.eup %2511 }
 0x93f   :  { %v1300_v23 = vsel %vm1298_vm14, %v2512_v7, 0.0  ;;  %v1299_v24 = vsel %vm1298_vm14, %v2512_v7, %v1216_v15 }
 0x940   :  { %1302 = vst.msk [vmem:[#allocation2] sm:$0x3] %vm1301_vm13, %v1300_v23  ;;  %2398 = vmatmul.mubr.msk.f32.vlgmr.msra.gmra.mxu0 %vm91_vm0, %v1299_v24  ;;  %v1935_v23 = vld [vmem:[%s3137_s18 + $0x18] sm:$0xff] }
 0x941   :  { %2412 = vmatpush3.msra.mxu0 %v2944_v54  ;;  %2419 = vmatprep.mubr.msk.f32.mxu0 %vm2557_vm1, %v2555_v3 }
 0x942   :  { %2413 = vmatprep.subr.mxu0 %v2555_v3 }
 0x943   :  { %2414 = vmatpush3.msra.mxu0 %v2970_v6 }
 0x944   :  { %2415 = vmatprep.subr.mxu0 %v2555_v3 }
 0x945   :  { %2416 = vmatpush3.msra.mxu0 %v2978_v8 }
 0x946   :  { %2417 = vmatprep.subr.mxu0 %v2555_v3 }
 0x947   :  { %2418 = vmatpush3.msra.mxu0 %v2987_v9 }
 0x948   :  { %2433 = vmatprep.subr.mxu0 %v2555_v3 }
 0xa00   :  { %v1372_v32 = vpop.f32.mrf.mxu0 }
 0xa01   :  { %v1377_v35 = vrot.slane %v1372_v32, 6  ;;  %v1932_v32 = vld [vmem:[%s3137_s18] sm:$0xff] }
 0xa02   :  { %v2399_v25 = vpop.f32.mrf.mxu0 }
 0xa03   :  { %v1379_v26 = vadd.f32 %v1377_v35, %v3010_v16  ;;  %v2117_v35 = vld [vmem:[%s3136_s17] ss:$0 sm:$0xff]  ;;  %s2558_s17 = smov [#allocation3]  }
 0xa05   :  { %2513 = vtanh.f32 %v1379_v26 }
 0xa12   :  { %v2514_v11 = vpop.eup %2513 }
 0xa13   :  { %v1388_v21 = vrot.slane %v2514_v11, 2 }
 0xa15   :  { %v1391_v27 = vsel %vm1386_vm15, %v1388_v21, 0.0  ;;  %v1390_v28 = vsel %vm1386_vm15, %v1388_v21, %v1299_v24  ;;  %v1933_v24 = vld [vmem:[%s3137_s18 + $0x8] sm:$0xff] }
 0xa16   :  { %1392 = vst.msk [vmem:[#allocation2 + $0x2] sm:$0x3] %vm1301_vm13, %v1391_v27  ;;  %2409 = vmatmul.mubr.msk.f32.vlgmr.msra.gmra.mxu1 %vm91_vm0, %v1390_v28 }
 0xa17   :  { %2423 = vmatpush3.msra.mxu1 %v2944_v54  ;;  %2430 = vmatprep.mubr.msk.f32.mxu1 %vm2557_vm1, %v2555_v3 }
 0xa18   :  { %2424 = vmatprep.subr.mxu1 %v2555_v3 }
 0xa19   :  { %2425 = vmatpush3.msra.mxu1 %v2970_v6 }
 0xa1a   :  { %2426 = vmatprep.subr.mxu1 %v2555_v3 }
 0xa1b   :  { %2427 = vmatpush3.msra.mxu1 %v2978_v8 }
 0xa1c   :  { %2428 = vmatprep.subr.mxu1 %v2555_v3 }
 0xa1d   :  { %2429 = vmatpush3.msra.mxu1 %v2987_v9 }
 0xa1e   :  { %2444 = vmatprep.subr.mxu1 %v2555_v3 }
 0xad6   :  { %v1462_v29 = vpop.f32.mrf.mxu1 }
 0xad7   :  { %v1467_v31 = vrot.slane %v1462_v29, 4 }
 0xad8   :  { %v2410_v33 = vpop.f32.mrf.mxu1 }
 0xad9   :  { %v1469_v36 = vadd.f32 %v1467_v31, %v3010_v16 }
 0xadb   :  { %2515 = vtanh.f32 %v1469_v36 }
 0xae8   :  { %v2516_v37 = vpop.eup %2515 }
 0xae9   :  { %v1478_v39 = vrot.slane %v2516_v37, 4 }
 0xaeb   :  { %v1481_v40 = vsel %vm1476_vm2, %v1478_v39, 0.0  ;;  %v1480_v41 = vsel %vm1476_vm2, %v1478_v39, %v1390_v28  ;;  %v2120_v28 = vld [vmem:[%s3138_s19] ss:$0 sm:$0xff] }
 0xaec   :  { %1482 = vst.msk [vmem:[#allocation2 + $0x4] sm:$0x3] %vm1301_vm13, %v1481_v40  ;;  %2420 = vmatmul.mubr.msk.f32.vlgmr.msra.gmra.mxu0 %vm91_vm0, %v1480_v41 }
 0xaed   :  { %2434 = vmatpush3.msra.mxu0 %v2944_v54  ;;  %2441 = vmatprep.mubr.msk.f32.mxu0 %vm2557_vm1, %v2555_v3 }
 0xaee   :  { %2435 = vmatprep.subr.mxu0 %v2555_v3 }
 0xaef   :  { %2436 = vmatpush3.msra.mxu0 %v2970_v6 }
 0xaf0   :  { %2437 = vmatprep.subr.mxu0 %v2555_v3 }
 0xaf1   :  { %2438 = vmatpush3.msra.mxu0 %v2978_v8 }
 0xaf2   :  { %2439 = vmatprep.subr.mxu0 %v2555_v3 }
 0xaf3   :  { %2440 = vmatpush3.msra.mxu0 %v2987_v9 }
 0xaf4   :  { %2455 = vmatprep.subr.mxu0 %v1841_v2 }
 0xbac   :  { %v1552_v42 = vpop.f32.mrf.mxu0 }
 0xbad   :  { %v1557_v43 = vrot.slane %v1552_v42, 2 }
 0xbae   :  { %v2421_v44 = vpop.f32.mrf.mxu0 }
 0xbaf   :  { %v1559_v45 = vadd.f32 %v1557_v43, %v3010_v16 }
 0xbb1   :  { %2517 = vtanh.f32 %v1559_v45 }
 0xbbe   :  { %v2518_v46 = vpop.eup %2517 }
 0xbbf   :  { %v1568_v48 = vrot.slane %v2518_v46, 6 }
 0xbc1   :  { %v1571_v49 = vsel %vm1566_vm3, %v1568_v48, 0.0  ;;  %v1570_v50 = vsel %vm1566_vm3, %v1568_v48, %v1480_v41 }
 0xbc2   :  { %1572 = vst.msk [vmem:[#allocation2 + $0x6] sm:$0x3] %vm1301_vm13, %v1571_v49  ;;  %2431 = vmatmul.mubr.msk.f32.vlgmr.msra.gmra.mxu1 %vm91_vm0, %v1570_v50 }
 0xbc3   :  { %2445 = vmatpush3.msra.mxu1 %v2944_v54  ;;  %2452 = vmatprep.mubr.msk.f32.mxu1 %vm2557_vm1, %v2555_v3  ;;  %vm1653_vm1 = vcmp.eq.s32.totalorder %v1652_v53, 1 }
 0xbc4   :  { %2446 = vmatprep.subr.mxu1 %v2555_v3 }
 0xbc5   :  { %2447 = vmatpush3.msra.mxu1 %v2970_v6  ;;  %v1838_v6 = vld [vmem:[%s3135_s16] sm:$0xff] }
 0xbc6   :  { %2448 = vmatprep.subr.mxu1 %v2555_v3 }
 0xbc7   :  { %2449 = vmatpush3.msra.mxu1 %v2978_v8  ;;  %v1939_v8 = vld [vmem:[%s3137_s18 + $0x38] sm:$0xff] }
 0xbc8   :  { %2450 = vmatprep.subr.mxu1 %v2555_v3 }
 0xbc9   :  { %2451 = vmatpush3.msra.mxu1 %v2987_v9  ;;  %v1836_v57 = vld [vmem:[#allocation2] sm:$0xff]  ;;  %v1938_v9 = vld [vmem:[%s3137_s18 + $0x30] sm:$0xff] }
 0xbca   :  { %2466 = vmatprep.subr.mxu1 %v1939_v8 }
 0xc82   :  { %v1642_v51 = vpop.f32.mrf.mxu1 }
 0xc83   :  { %v1646_v52 = vadd.f32 %v1642_v51, %v2806_v34 }
 0xc84   :  { %v2432_v30 = vpop.f32.mrf.mxu1 }
 0xc85   :  { %2519 = vtanh.f32 %v1646_v52 }
 0xc92   :  { %v2520_v54 = vpop.eup %2519 }
 0xc93   :  { %v1655_v55 = vsel %vm1653_vm1, %v2520_v54, 0.0  ;;  %v1654_v56 = vsel %vm1653_vm1, %v2520_v54, %v1570_v50 }
 0xc94   :  { %1656 = vst.msk [vmem:[#allocation2 + $0x8] sm:$0x3] %vm1301_vm13, %v1655_v55  ;;  %2442 = vmatmul.mubr.msk.f32.vlgmr.msra.gmra.mxu0 %vm91_vm0, %v1654_v56 }
 0xc95   :  { %2463 = vmatprep.mubr.msk.f32.mxu0 %vm91_vm0, %v1836_v57  ;;  %2456 = vmatpush3.msra.mxu0 %v1841_v2 }
 0xc96   :  { %2457 = vmatprep.subr.mxu0 %v1840_v4 }
 0xc97   :  { %2458 = vmatpush3.msra.mxu0 %v1840_v4 }
 0xc98   :  { %2459 = vmatprep.subr.mxu0 %v1839_v5 }
 0xc99   :  { %2460 = vmatpush3.msra.mxu0 %v1839_v5 }
 0xc9a   :  { %2461 = vmatprep.subr.mxu0 %v1838_v6 }
 0xc9b   :  { %2462 = vmatpush3.msra.mxu0 %v1838_v6 }
 0xd54   :  { %v1726_v3 = vpop.f32.mrf.mxu0 }
 0xd55   :  { %v1731_v58 = vrot.slane %v1726_v3, 6 }
 0xd56   :  { %v2443_v59 = vpop.f32.mrf.mxu0 }
 0xd57   :  { %v1733_v60 = vadd.f32 %v1731_v58, %v2806_v34 }
 0xd59   :  { %2521 = vtanh.f32 %v1733_v60 }
 0xd66   :  { %v2522_v62 = vpop.eup %2521 }
 0xd67   :  { %v1742_v63 = vrot.slane %v2522_v62, 2 }
 0xd69   :  { %v1745_v0 = vsel %vm1740_vm4, %v1742_v63, 0.0  ;;  %v1744_v1 = vsel %vm1740_vm4, %v1742_v63, %v1654_v56 }
 0xd6a   :  { %1746 = vst.msk [vmem:[#allocation2 + $0xa] sm:$0x3] %vm1301_vm13, %v1745_v0  ;;  %2453 = vmatmul.mubr.msk.f32.vlgmr.msra.gmra.mxu1 %vm91_vm0, %v1744_v1 }
 0xd6b   :  { %2467 = vmatpush3.msra.mxu1 %v1939_v8 }
 0xd6c   :  { %2468 = vmatprep.subr.mxu1 %v1938_v9 }
 0xd6d   :  { %2469 = vmatpush3.msra.mxu1 %v1938_v9 }
 0xd6e   :  { %2470 = vmatprep.subr.mxu1 %v1937_v10 }
 0xd6f   :  { %2471 = vmatpush3.msra.mxu1 %v1937_v10 }
 0xd70   :  { %2472 = vmatprep.subr.mxu1 %v1936_v12 }
 0xd71   :  { %2473 = vmatpush3.msra.mxu1 %v1936_v12 }
 0xd72   :  { %2474 = vmatprep.subr.mxu1 %v1935_v23 }
 0xd73   :  { %2475 = vmatpush3.msra.mxu1 %v1935_v23 }
 0xe2a   :  { %v1816_v13 = vpop.f32.mrf.mxu1 }
 0xe2b   :  { %v1821_v14 = vrot.slane %v1816_v13, 4 }
 0xe2c   :  { %v2454_v15 = vpop.f32.mrf.mxu1 }
 0xe2d   :  { %v1823_v16 = vadd.f32 %v1821_v14, %v2806_v34  ;;  %v1934_v34 = vld [vmem:[%s3137_s18 + $0x10] sm:$0xff]  ;;  %s2071_s18 = sshll.u32 %s2558_s17, 4  ;;  %s2072_s18 = int_to_ptr.vmem [resolvable:$true] %s2071_s18 }
 0xe2e   :  { %2476 = vmatprep.subr.mxu1 %v1934_v34  ;;  %s2533_s19 = scalar_lea.vmem %s2072_s18, 256  ;;  %p2538_p1 = scmp.lt.s32.totalorder %s2072_s18, %s2072_s18 }
 0xe2f   :  { %2523 = vtanh.f32 %v1823_v16  ;;  %2477 = vmatpush3.msra.mxu1 %v1934_v34  ;;  %p2534_p0 = scmp.ne.s32.totalorder %s2072_s18, %s2533_s19  ;;  %p2539_p2 = scmp.lt.s32.totalorder %s2533_s19, %s2533_s19 }
 0xe30   :  { %2478 = vmatprep.subr.mxu1 %v1933_v24 }
 0xe31   :  { %2479 = vmatpush3.msra.mxu1 %v1933_v24  ;;  %p2540_p3 = por %p2539_p2, %p2538_p1 }
 0xe32   :  { %2480 = vmatprep.subr.mxu1 %v1932_v32 }
 0xe33   :  { %2481 = vmatpush3.msra.mxu1 %v1932_v32  ;;  %p2541_p4 = pnand %p2540_p3, %p2534_p0 }
 0xe3c   :  { %v2524_v19 = vpop.eup %2523 }
 0xe3d   :  { %v1832_v20 = vrot.slane %v2524_v19, 4 }
 0xe3f   :  { %v1834_v22 = vsel %vm1830_vm5, %v1832_v20, 0.0 }
 0xe40   :  { %1835 = vst.msk [vmem:[#allocation2 + $0xc] sm:$0x3] %vm1301_vm13, %v1834_v22 }
 0xe47   :  { %v1837_v7 = vld [vmem:[#allocation2 + $0x8] sm:$0x3f] }
 0xe48   :  { %2464 = vmatmul.mubr.msk.f32.vlgmr.msra.gmra.mxu0 %vm91_vm0, %v1837_v7  ;;  %vm1947_vm0 = vcmask 523264  }
 0xf08   :  { %v2465_v25 = vpop.f32.mrf.mxu0 }
 0xf09   :  { %v1927_v26 = vadd.f32 %v2465_v25, %v2117_v35 }
 0xf0a   :  { %v1921_v11 = vpop.f32.mrf.mxu0 }
 0xf0b   :  { %v1922_v18 = vadd.f32 %v2117_v35, %v1921_v11  ;;  %v1931_v27 = vmax.f32 %v1927_v26, 0.0 }
 0xf0d   :  { %v1930_v21 = vmax.f32 %v1922_v18, 0.0 }
 0xf0f   :  { %2482 = vmatprep.mubr.msk.f32.mxu1 %vm1947_vm0, %v1930_v21 }
 0xf10   :  { %2483 = vmatmul.mubr.msk.f32.vlgmr.msra.gmra.mxu1 %vm1947_vm0, %v1931_v27 }
 0xfd0   :  { %v2484_v29 = vpop.f32.mrf.mxu1 }
 0xfd1   :  { %v2026_v31 = vadd.f32 %v2484_v29, %v2120_v28 }
 0xfd2   :  { %v2020_v33 = vpop.f32.mrf.mxu1 }
 0xfd3   :  { %v2021_v36 = vadd.f32 %v2120_v28, %v2020_v33  ;;  %v2032_v37 = vsel %vm2031_vm6, %v2026_v31, -inf }
 0xfd4   :  { %2033 = vmax.xlane.f32.xlu1 %v2032_v37 }
 0xfd5   :  { %2029 = vmax.xlane.f32.xlu0 %v2021_v36 }
0x105d   :  { %v2034_v38 = vpop.xlane.xlu1 %2033 }
0x105e   :  { %v2036_v39 = vsub.f32 %v2026_v31, %v2034_v38  ;;  %v2030_v40 = vpop.xlane.xlu0 %2029 }
0x105f   :  { %v2035_v41 = vsub.f32 %v2021_v36, %v2030_v40 }
0x1060   :  { %v2039_v42 = vmul.f32 1.442695, %v2036_v39 }
0x1061   :  { %v2037_v43 = vmul.f32 1.442695, %v2035_v41 }
0x1062   :  { %2525 = vpow2.f32 %v2039_v42 }
0x1063   :  { %2527 = vpow2.f32 %v2037_v43 }
0x106f   :  { %v2526_v44 = vpop.eup %2525 }
0x1070   :  { %v2528_v45 = vpop.eup %2527  ;;  %v2043_v46 = vsel %vm2031_vm6, %v2526_v44, 0.0 }
0x1071   :  { %2044 = vadd.xlane.f32.xlu1 %v2043_v46  ;;  %2041 = vadd.xlane.f32.xlu0 %v2528_v45 }
0x10fa   :  { %v2045_v47 = vpop.xlane.xlu1 %2044  ;;  %v2042_v48 = vpop.xlane.xlu0 %2041 }
0x10fb   :  { %2529 = vlog2.f32 %v2045_v47 }
0x10fc   :  { %2531 = vlog2.f32 %v2042_v48 }
0x1108   :  { %v2530_v49 = vpop.eup %2529 }
0x1109   :  { %v2532_v50 = vpop.eup %2531  ;;  %v2049_v51 = vmul.f32 0.6931472, %v2530_v49 }
0x110a   :  { %v2047_v52 = vmul.f32 0.6931472, %v2532_v50 }
0x110b   :  { %v2051_v30 = vsub.f32 %v2036_v39, %v2049_v51 }
0x110c   :  { %v2050_v53 = vsub.f32 %v2035_v41, %v2047_v52 }
0x110d   :  { %2060 = vst [vmem:[#allocation3 + $0x4] ss:$8 sps:$4 sm:$0x21] %v2051_v30   ;;  %2061 = vst [vmem:[#allocation3 + $0xa] ss:$-4 sps:$4 sm:$0x12] %v2051_v30  }
0x110e   :  { %2062 = vst [vmem:[#allocation3 + $0x3] sm:$0x4] %v2051_v30  ;;  %2063 = vst [vmem:[#allocation3 + $0x9] sm:$0x8] %v2051_v30 }
0x110f   :  { %2052 = vst [vmem:[#allocation3] ss:$8 sps:$4 sm:$0x21] %v2050_v53   ;;  %2053 = vst [vmem:[#allocation3 + $0x6] ss:$-4 sps:$4 sm:$0x12] %v2050_v53  }
0x1110   :  { %2054 = vst [vmem:[#allocation3 - $0x1] ss:$8 sps:$4 sm:$0x84] %v2050_v53   ;;  %2055 = vst [vmem:[#allocation3 + $0x5] ss:$-4 sps:$4 sm:$0x48] %v2050_v53  }
0x1111   :  { %2544 = shalt.err (!%p2541_p4)
}
0x1112   :  { %s2559_s15 = smov 128   ;;  %s2560_s12 = smov 8  }
0x1113   :  { %2077 = dma.vmem_to_hbm [thread:$0]  %s2072_s18, 256, %s3139_s20, [#allocation4], %s2559_s15, %s2559_s15, %s2560_s12  }
0x1114   :  { %2553 = dma.done.wait [#allocation4], 256  }
0x1115   :  { %2554 = vsyncadd [#allocation4], 4294967040 }
0x1116   :  { %2089 = vsyncpa [#allocation4], 1 }

</bundles_post_ra>
